<compile_context>
chip_gen: v5e
topology: v5e:2x2
jax: 0.10.0
libtpu: 0.0.40
codegen_flags: <defaults>
</compile_context>

<pallas_src>
import functools

import jax
import jax.numpy as jnp
from jax.experimental import pallas as pl
from jax.experimental.pallas import tpu as pltpu

EPS = 1e-5

# ---- column layout of the packed per-channel parameter slab (C_out, PK_COLS) ----
PC_WC1 = 0                      # 5 taps: LKA.conv1 depthwise k=5
PC_WCS = 5                      # 7 taps: LKA.conv_spatial depthwise k=7, dil=3
PC_G_P1, PC_B_P1 = 12, 13       # BN(proj_1)
PC_G_C1, PC_B_C1 = 14, 15       # BN(LKA.conv1)
PC_G_CS, PC_B_CS = 16, 17       # BN(LKA.conv_spatial)
PC_G_C2, PC_B_C2 = 18, 19       # BN(LKA.conv2)
PC_G_LKA, PC_B_LKA = 20, 21     # LKA.bn
PC_G_P2, PC_B_P2 = 22, 23       # BN(proj_2)
PC_G_DS, PC_B_DS = 24, 25       # BN(downsample)
PC_B_FC2 = 26                   # excitation fc2 bias (length C)
PC_B_FC1 = 27                   # excitation fc1 bias (zero-padded to C)
PK_COLS = 28

# Depthwise-conv tap offsets: out[l] += w[k] * x[l + off], off = k*dil - pad.
OFFS_C1 = tuple(k - 2 for k in range(5))        # k=5, dil=1, pad=2
OFFS_CS = tuple(3 * k - 9 for k in range(7))    # k=7, dil=3, pad=9
NONZERO_OFFS = tuple(sorted(set(OFFS_C1 + OFFS_CS) - {0}))   # 10 offsets
MASK_ROW = {off: i for i, off in enumerate(NONZERO_OFFS)}


def basic_block_kernel(x_ref, pk_ref, w_p1ds_ref, w_c2_ref, w_p2_ref,
                       w_fc1_ref, w_fc2_ref, avg_ref, mask_ref, out_ref, *,
                       hid_p, has_downsample):
    f32 = jnp.float32
    c_out, nl = out_ref.shape

    x = x_ref[...]                 # (Cin, NL) lane-dense slab, f32
    pk = pk_ref[...]               # (Cout, PK_COLS) packed per-channel params
    masks = mask_ref[...]          # (10, NL) per-offset validity masks, f32

    # ---- hoist every per-channel single-column extract to one block ----
    taps_c1 = [pk[:, PC_WC1 + k:PC_WC1 + k + 1] for k in range(5)]
    taps_cs = [pk[:, PC_WCS + k:PC_WCS + k + 1] for k in range(7)]
    g_p1, b_p1 = pk[:, PC_G_P1:PC_G_P1 + 1], pk[:, PC_B_P1:PC_B_P1 + 1]
    g_c1, b_c1 = pk[:, PC_G_C1:PC_G_C1 + 1], pk[:, PC_B_C1:PC_B_C1 + 1]
    g_cs, b_cs = pk[:, PC_G_CS:PC_G_CS + 1], pk[:, PC_B_CS:PC_B_CS + 1]
    g_c2, b_c2 = pk[:, PC_G_C2:PC_G_C2 + 1], pk[:, PC_B_C2:PC_B_C2 + 1]
    g_lka, b_lka = pk[:, PC_G_LKA:PC_G_LKA + 1], pk[:, PC_B_LKA:PC_B_LKA + 1]
    g_p2, b_p2 = pk[:, PC_G_P2:PC_G_P2 + 1], pk[:, PC_B_P2:PC_B_P2 + 1]
    g_ds, b_ds = pk[:, PC_G_DS:PC_G_DS + 1], pk[:, PC_B_DS:PC_B_DS + 1]
    b_fc2 = pk[:, PC_B_FC2:PC_B_FC2 + 1]
    b_fc1 = pk[:hid_p, PC_B_FC1:PC_B_FC1 + 1]

    def bn(y, g, b, relu=True):
        # Training-mode BatchNorm1d over the (N*L) lane axis, single pass,
        # fused scale/shift form: out = y*s + t.
        m = jnp.mean(y, axis=1, keepdims=True)
        ms = jnp.mean(y * y, axis=1, keepdims=True)
        var = jnp.maximum(ms - m * m, 0.0)
        s = g * jax.lax.rsqrt(var + EPS)        # (C, 1)
        t = b - m * s                           # (C, 1)
        out = y * s + t
        return jnp.maximum(out, 0.0) if relu else out

    def dwconv(y, taps, offsets):
        # Depthwise conv: XLU lane rotation per tap; precomputed per-offset
        # masks implement zero padding and the no-bleed rule across the N
        # batch segments packed along the lane axis.
        out = y * taps[offsets.index(0)]        # off==0 tap: unmasked, init acc
        for k, off in enumerate(offsets):       # static unroll (5 / 7 taps)
            if off == 0:
                continue
            shifted = pltpu.roll(y, shift=(-off) % nl, axis=1)
            r = MASK_ROW[off]
            out = out + shifted * taps[k] * masks[r:r + 1, :]
        return out

    def pwconv(w_ref, y):
        return jnp.dot(w_ref[...], y, preferred_element_type=f32)

    # -------- proj_1 + downsample fused into ONE MXU contraction against x --------
    both = pwconv(w_p1ds_ref, x)                # (C or 2C, NL)
    if has_downsample:
        h = bn(both[:c_out], g_p1, b_p1)
        ident = bn(both[c_out:], g_ds, b_ds, relu=False)
    else:
        h = bn(both, g_p1, b_p1)
        ident = x                               # c_in == c_out, stride == 1

    # ---------------- residual = LKABlock ----------------
    identity_lka = h
    o = bn(dwconv(h, taps_c1, OFFS_C1), g_c1, b_c1)      # LKA.conv1: k=5, p=2
    o = bn(dwconv(o, taps_cs, OFFS_CS), g_cs, b_cs)      # LKA.conv_spatial: k=7, dil=3
    o = bn(pwconv(w_c2_ref, o), g_c2, b_c2)              # LKA.conv2: 1x1
    o = bn(o * identity_lka, g_lka, b_lka)               # attention gate + BN + ReLU
    # proj_2: 1x1 conv + BN (no ReLU).  Conv bias dropped: a per-channel
    # constant before a training-mode BN is cancelled exactly by the mean.
    res = bn(pwconv(w_p2_ref, o), g_p2, b_p2, relu=False)

    # ---------------- squeeze & excitation ----------------
    # Adaptive avg-pool over L + broadcast back per batch segment = one MXU
    # matmul against the wrapper-built (NL, NL) block-averaging matrix.
    sq = jnp.dot(res, avg_ref[...], preferred_element_type=f32)        # (C, NL)
    z1 = jnp.maximum(
        jnp.dot(w_fc1_ref[...], sq, preferred_element_type=f32) + b_fc1, 0.0)
    exc = jax.nn.sigmoid(
        jnp.dot(w_fc2_ref[...], z1, preferred_element_type=f32) + b_fc2)

    # gate, skip connection, final ReLU — lane-dense unmasked store.
    out_ref[...] = jnp.maximum(res * exc + ident, 0.0).astype(out_ref.dtype)


def basic_block(x, params, stride=1):
    n_batch, c_in, length = x.shape
    c_out = params["w_p1"].shape[0]
    hid = params["w_fc1"].shape[0]
    hid_p = max(8, hid)                 # pad SE hidden dim up to one sublane tile
    l_out = (length - 1) // stride + 1
    nl = n_batch * l_out
    has_ds = (stride != 1) or (c_in != c_out)
    if not has_ds:
        # identity skip path requires shape match (same rule as the PyTorch module)
        assert c_in == c_out and stride == 1
    f32 = jnp.float32

    # Fold stride + NCL -> (Cin, N*L_out) layout in one fused XLA pass on the
    # (tiny) input, so the kernel works on a lane-dense slab.
    x2d = jnp.transpose(x[:, :, ::stride], (1, 0, 2)).reshape(c_in, nl).astype(f32)

    def col(v):
        return jnp.reshape(v.astype(f32), (-1, 1))

    b_fc1_pad = jnp.zeros((c_out,), f32).at[:hid].set(params["b_fc1"].astype(f32))
    if has_ds:
        g_ds, b_ds = params["g_ds"], params["b_ds"]
        # proj_1 and downsample read the same x: stack weights -> one contraction.
        w_p1ds = jnp.concatenate(
            [params["w_p1"].astype(f32), params["w_ds"].astype(f32)], axis=0)
    else:
        g_ds = jnp.ones((c_out,), f32)
        b_ds = jnp.zeros((c_out,), f32)
        w_p1ds = params["w_p1"].astype(f32)

    # One packed slab for all per-channel params + depthwise taps => one DMA.
    pk = jnp.concatenate([
        params["w_c1"].astype(f32),                  # (C, 5)
        params["w_cs"].astype(f32),                  # (C, 7)
        col(params["g_p1"]), col(params["b_p1"]),
        col(params["g_c1"]), col(params["b_c1"]),
        col(params["g_cs"]), col(params["b_cs"]),
        col(params["g_c2"]), col(params["b_c2"]),
        col(params["g_lka"]), col(params["b_lka"]),
        col(params["g_p2"]), col(params["b_p2"]),
        col(g_ds), col(b_ds),
        col(params["b_fc2"]),
        col(b_fc1_pad),
    ], axis=1)
    assert pk.shape == (c_out, PK_COLS)

    # Zero-pad the SE weights so every matmul dim is >= 8 (mathematically exact).
    w_fc1p = jnp.zeros((hid_p, c_out), f32).at[:hid].set(params["w_fc1"].astype(f32))
    w_fc2p = jnp.zeros((c_out, hid_p), f32).at[:, :hid].set(params["w_fc2"].astype(f32))

    # SE block-averaging matrix, built wrapper-side (was in-kernel iota math).
    seg = jnp.arange(nl, dtype=jnp.int32) // l_out
    avg_mat = (seg[:, None] == seg[None, :]).astype(f32) / jnp.asarray(l_out, f32)

    # Per-offset depthwise-conv validity masks (zero padding + segment borders).
    pos = jnp.arange(nl, dtype=jnp.int32) % l_out
    masks = jnp.stack(
        [((pos + off >= 0) & (pos + off < l_out)).astype(f32)
         for off in NONZERO_OFFS], axis=0)                     # (10, NL)

    vmem = pl.BlockSpec(memory_space=pltpu.MemorySpace.VMEM)
    kernel = functools.partial(
        basic_block_kernel, hid_p=hid_p, has_downsample=has_ds)
    out2d = pl.pallas_call(
        kernel,
        out_shape=jax.ShapeDtypeStruct((c_out, nl), f32),
        in_specs=[vmem] * 9,
        out_specs=vmem,
        # Footprint is ~0.4 MiB; compiler-default VMEM limits are plenty.
        # TODO(synk): at production NL, add an L-tiled grid (halo=18) sized
        # against v7x's 64 MiB VMEM, a "parallel" grid axis for its 2 TCs, and
        # bf16 MXU operands on v6e/v7x (gated via pltpu.get_tpu_info).
    )(x2d, pk, w_p1ds,
      params["w_c2"].astype(f32), params["w_p2"].astype(f32),
      w_fc1p, w_fc2p, avg_mat, masks)

    # Layout plumbing back to NCL (cheap wrapper-side transpose).
    return jnp.transpose(out2d.reshape(c_out, n_batch, l_out), (1, 0, 2))


def init_params(key, c_in, c_out, ratio=16):
    ks = jax.random.split(key, 24)
    f32 = jnp.float32
    hid = max(c_out // ratio, 1)

    def nrm(k, shape, scale=0.1):
        return (scale * jax.random.normal(k, shape)).astype(f32)

    def gamma(k, c):
        return (1.0 + 0.05 * jax.random.normal(k, (c,))).astype(f32)

    def beta(k, c):
        return (0.05 * jax.random.normal(k, (c,))).astype(f32)

    return {
        # LKABlock.proj_1: Conv1d(c_in, c_out, 1, stride, bias=False) + BN + ReLU
        "w_p1": nrm(ks[0], (c_out, c_in)),
        "g_p1": gamma(ks[1], c_out), "b_p1": beta(ks[2], c_out),
        # LKA.conv1: depthwise Conv1d(k=5, p=2, groups=c_out) + BN + ReLU
        "w_c1": nrm(ks[3], (c_out, 5)),
        "g_c1": gamma(ks[4], c_out), "b_c1": beta(ks[5], c_out),
        # LKA.conv_spatial: depthwise Conv1d(k=7, p=9, dil=3) + BN + ReLU
        "w_cs": nrm(ks[6], (c_out, 7)),
        "g_cs": gamma(ks[7], c_out), "b_cs": beta(ks[8], c_out),
        # LKA.conv2: Conv1d(c_out, c_out, 1) + BN + ReLU
        "w_c2": nrm(ks[9], (c_out, c_out)),
        "g_c2": gamma(ks[10], c_out), "b_c2": beta(ks[11], c_out),
        # LKA.bn
        "g_lka": gamma(ks[12], c_out), "b_lka": beta(ks[13], c_out),
        # proj_2: Conv1d(c_out, c_out, 1, bias=True) + BN.
        # (conv bias omitted: exactly cancelled by the training-mode BN mean)
        "w_p2": nrm(ks[14], (c_out, c_out)),
        "g_p2": gamma(ks[15], c_out), "b_p2": beta(ks[16], c_out),
        # downsample: Conv1d(c_in, c_out, 1, stride, bias=False) + BN
        "w_ds": nrm(ks[17], (c_out, c_in)),
        "g_ds": gamma(ks[18], c_out), "b_ds": beta(ks[19], c_out),
        # squeeze-excitation: Linear(c_out, hid)+ReLU, Linear(hid, c_out)+Sigmoid
        "w_fc1": nrm(ks[20], (hid, c_out)), "b_fc1": nrm(ks[21], (hid,)),
        "w_fc2": nrm(ks[22], (c_out, hid)), "b_fc2": nrm(ks[23], (c_out,)),
    }


if __name__ == "__main__":
    key = jax.random.PRNGKey(0)
    k_x, k_p = jax.random.split(key)

    N, C_IN, C_OUT, L, STRIDE, RATIO = 2, 4, 32, 128, 2, 16
    x = jax.random.normal(k_x, (N, C_IN, L), dtype=jnp.float32)
    params = init_params(k_p, C_IN, C_OUT, RATIO)

    fn = jax.jit(functools.partial(basic_block, stride=STRIDE))
    out = fn(x, params)
    jax.block_until_ready(out)

    L_OUT = (L - 1) // STRIDE + 1
    assert out.shape == (N, C_OUT, L_OUT)
    assert bool(jnp.all(jnp.isfinite(out)))
    print("KERNEL_OK")
</pallas_src>

<mosaic_0001>
module attributes {stable_mosaic.version = 11 : i64} {
  func.func @basic_block_kernel(%arg0: memref<4x128xf32, #tpu.memory_space<vmem>>, %arg1: memref<32x28xf32, #tpu.memory_space<vmem>>, %arg2: memref<64x4xf32, #tpu.memory_space<vmem>>, %arg3: memref<32x32xf32, #tpu.memory_space<vmem>>, %arg4: memref<32x32xf32, #tpu.memory_space<vmem>>, %arg5: memref<8x32xf32, #tpu.memory_space<vmem>>, %arg6: memref<32x8xf32, #tpu.memory_space<vmem>>, %arg7: memref<128x128xf32, #tpu.memory_space<vmem>>, %arg8: memref<10x128xf32, #tpu.memory_space<vmem>>, %arg9: memref<32x128xf32, #tpu.memory_space<vmem>>) attributes {dimension_semantics = [], scalar_prefetch = 0 : i64, scratch_operands = 0 : i64, tpu.core_type = #tpu.core_type<tc>} {
    %c0 = arith.constant 0 : index
    %c0_0 = arith.constant 0 : index
    %0 = vector.load %arg0[%c0, %c0_0] : memref<4x128xf32, #tpu.memory_space<vmem>>, vector<4x128xf32>
    %c0_1 = arith.constant 0 : index
    %c0_2 = arith.constant 0 : index
    %1 = vector.load %arg1[%c0_1, %c0_2] : memref<32x28xf32, #tpu.memory_space<vmem>>, vector<32x28xf32>
    %c0_3 = arith.constant 0 : index
    %c0_4 = arith.constant 0 : index
    %2 = vector.load %arg8[%c0_3, %c0_4] : memref<10x128xf32, #tpu.memory_space<vmem>>, vector<10x128xf32>
    %3 = vector.extract_strided_slice %1 {offsets = [0, 0], sizes = [32, 1], strides = [1, 1]} : vector<32x28xf32> to vector<32x1xf32>
    %4 = vector.extract_strided_slice %1 {offsets = [0, 1], sizes = [32, 1], strides = [1, 1]} : vector<32x28xf32> to vector<32x1xf32>
    %5 = vector.extract_strided_slice %1 {offsets = [0, 2], sizes = [32, 1], strides = [1, 1]} : vector<32x28xf32> to vector<32x1xf32>
    %6 = vector.extract_strided_slice %1 {offsets = [0, 3], sizes = [32, 1], strides = [1, 1]} : vector<32x28xf32> to vector<32x1xf32>
    %7 = vector.extract_strided_slice %1 {offsets = [0, 4], sizes = [32, 1], strides = [1, 1]} : vector<32x28xf32> to vector<32x1xf32>
    %8 = vector.extract_strided_slice %1 {offsets = [0, 5], sizes = [32, 1], strides = [1, 1]} : vector<32x28xf32> to vector<32x1xf32>
    %9 = vector.extract_strided_slice %1 {offsets = [0, 6], sizes = [32, 1], strides = [1, 1]} : vector<32x28xf32> to vector<32x1xf32>
    %10 = vector.extract_strided_slice %1 {offsets = [0, 7], sizes = [32, 1], strides = [1, 1]} : vector<32x28xf32> to vector<32x1xf32>
    %11 = vector.extract_strided_slice %1 {offsets = [0, 8], sizes = [32, 1], strides = [1, 1]} : vector<32x28xf32> to vector<32x1xf32>
    %12 = vector.extract_strided_slice %1 {offsets = [0, 9], sizes = [32, 1], strides = [1, 1]} : vector<32x28xf32> to vector<32x1xf32>
    %13 = vector.extract_strided_slice %1 {offsets = [0, 10], sizes = [32, 1], strides = [1, 1]} : vector<32x28xf32> to vector<32x1xf32>
    %14 = vector.extract_strided_slice %1 {offsets = [0, 11], sizes = [32, 1], strides = [1, 1]} : vector<32x28xf32> to vector<32x1xf32>
    %15 = vector.extract_strided_slice %1 {offsets = [0, 12], sizes = [32, 1], strides = [1, 1]} : vector<32x28xf32> to vector<32x1xf32>
    %16 = vector.extract_strided_slice %1 {offsets = [0, 13], sizes = [32, 1], strides = [1, 1]} : vector<32x28xf32> to vector<32x1xf32>
    %17 = vector.extract_strided_slice %1 {offsets = [0, 14], sizes = [32, 1], strides = [1, 1]} : vector<32x28xf32> to vector<32x1xf32>
    %18 = vector.extract_strided_slice %1 {offsets = [0, 15], sizes = [32, 1], strides = [1, 1]} : vector<32x28xf32> to vector<32x1xf32>
    %19 = vector.extract_strided_slice %1 {offsets = [0, 16], sizes = [32, 1], strides = [1, 1]} : vector<32x28xf32> to vector<32x1xf32>
    %20 = vector.extract_strided_slice %1 {offsets = [0, 17], sizes = [32, 1], strides = [1, 1]} : vector<32x28xf32> to vector<32x1xf32>
    %21 = vector.extract_strided_slice %1 {offsets = [0, 18], sizes = [32, 1], strides = [1, 1]} : vector<32x28xf32> to vector<32x1xf32>
    %22 = vector.extract_strided_slice %1 {offsets = [0, 19], sizes = [32, 1], strides = [1, 1]} : vector<32x28xf32> to vector<32x1xf32>
    %23 = vector.extract_strided_slice %1 {offsets = [0, 20], sizes = [32, 1], strides = [1, 1]} : vector<32x28xf32> to vector<32x1xf32>
    %24 = vector.extract_strided_slice %1 {offsets = [0, 21], sizes = [32, 1], strides = [1, 1]} : vector<32x28xf32> to vector<32x1xf32>
    %25 = vector.extract_strided_slice %1 {offsets = [0, 22], sizes = [32, 1], strides = [1, 1]} : vector<32x28xf32> to vector<32x1xf32>
    %26 = vector.extract_strided_slice %1 {offsets = [0, 23], sizes = [32, 1], strides = [1, 1]} : vector<32x28xf32> to vector<32x1xf32>
    %27 = vector.extract_strided_slice %1 {offsets = [0, 24], sizes = [32, 1], strides = [1, 1]} : vector<32x28xf32> to vector<32x1xf32>
    %28 = vector.extract_strided_slice %1 {offsets = [0, 25], sizes = [32, 1], strides = [1, 1]} : vector<32x28xf32> to vector<32x1xf32>
    %29 = vector.extract_strided_slice %1 {offsets = [0, 26], sizes = [32, 1], strides = [1, 1]} : vector<32x28xf32> to vector<32x1xf32>
    %30 = vector.extract_strided_slice %1 {offsets = [0, 27], sizes = [8, 1], strides = [1, 1]} : vector<32x28xf32> to vector<8x1xf32>
    %c0_5 = arith.constant 0 : index
    %c0_6 = arith.constant 0 : index
    %31 = vector.load %arg2[%c0_5, %c0_6] : memref<64x4xf32, #tpu.memory_space<vmem>>, vector<64x4xf32>
    %cst = arith.constant dense<0.000000e+00> : vector<64x128xf32>
    %32 = tpu.matmul %31, %0, %cst {dimension_numbers = #tpu.dot_dimension_numbers<[1], [0], [0], [1], [0, 0, 1, 1], [], []>} : vector<64x4xf32>, vector<4x128xf32>, vector<64x128xf32> -> vector<64x128xf32>
    %33 = vector.extract_strided_slice %32 {offsets = [0, 0], sizes = [32, 128], strides = [1, 1]} : vector<64x128xf32> to vector<32x128xf32>
    %cst_7 = arith.constant dense<0.000000e+00> : vector<32xf32>
    %34 = vector.multi_reduction <add>, %33, %cst_7 [1] : vector<32x128xf32> to vector<32xf32>
    %35 = vector.shape_cast %34 : vector<32xf32> to vector<32x1xf32>
    %cst_8 = arith.constant 1.280000e+02 : f32
    %36 = vector.broadcast %cst_8 : f32 to vector<32x1xf32>
    %37 = arith.divf %35, %36 : vector<32x1xf32>
    %38 = arith.mulf %33, %33 : vector<32x128xf32>
    %cst_9 = arith.constant dense<0.000000e+00> : vector<32xf32>
    %39 = vector.multi_reduction <add>, %38, %cst_9 [1] : vector<32x128xf32> to vector<32xf32>
    %40 = vector.shape_cast %39 : vector<32xf32> to vector<32x1xf32>
    %cst_10 = arith.constant 1.280000e+02 : f32
    %41 = vector.broadcast %cst_10 : f32 to vector<32x1xf32>
    %42 = arith.divf %40, %41 : vector<32x1xf32>
    %43 = arith.mulf %37, %37 : vector<32x1xf32>
    %44 = arith.subf %42, %43 : vector<32x1xf32>
    %cst_11 = arith.constant 0.000000e+00 : f32
    %45 = vector.broadcast %cst_11 : f32 to vector<32x1xf32>
    %46 = arith.maximumf %44, %45 : vector<32x1xf32>
    %cst_12 = arith.constant 9.99999974E-6 : f32
    %47 = vector.broadcast %cst_12 : f32 to vector<32x1xf32>
    %48 = arith.addf %46, %47 : vector<32x1xf32>
    %49 = math.rsqrt %48 : vector<32x1xf32>
    %50 = arith.mulf %15, %49 : vector<32x1xf32>
    %51 = arith.mulf %37, %50 : vector<32x1xf32>
    %52 = arith.subf %16, %51 : vector<32x1xf32>
    %53 = vector.broadcast %50 : vector<32x1xf32> to vector<32x128xf32>
    %54 = arith.mulf %33, %53 : vector<32x128xf32>
    %55 = vector.broadcast %52 : vector<32x1xf32> to vector<32x128xf32>
    %56 = arith.addf %54, %55 : vector<32x128xf32>
    %cst_13 = arith.constant 0.000000e+00 : f32
    %57 = vector.broadcast %cst_13 : f32 to vector<32x128xf32>
    %58 = arith.maximumf %56, %57 : vector<32x128xf32>
    %59 = vector.extract_strided_slice %32 {offsets = [32, 0], sizes = [32, 128], strides = [1, 1]} : vector<64x128xf32> to vector<32x128xf32>
    %cst_14 = arith.constant dense<0.000000e+00> : vector<32xf32>
    %60 = vector.multi_reduction <add>, %59, %cst_14 [1] : vector<32x128xf32> to vector<32xf32>
    %61 = vector.shape_cast %60 : vector<32xf32> to vector<32x1xf32>
    %cst_15 = arith.constant 1.280000e+02 : f32
    %62 = vector.broadcast %cst_15 : f32 to vector<32x1xf32>
    %63 = arith.divf %61, %62 : vector<32x1xf32>
    %64 = arith.mulf %59, %59 : vector<32x128xf32>
    %cst_16 = arith.constant dense<0.000000e+00> : vector<32xf32>
    %65 = vector.multi_reduction <add>, %64, %cst_16 [1] : vector<32x128xf32> to vector<32xf32>
    %66 = vector.shape_cast %65 : vector<32xf32> to vector<32x1xf32>
    %cst_17 = arith.constant 1.280000e+02 : f32
    %67 = vector.broadcast %cst_17 : f32 to vector<32x1xf32>
    %68 = arith.divf %66, %67 : vector<32x1xf32>
    %69 = arith.mulf %63, %63 : vector<32x1xf32>
    %70 = arith.subf %68, %69 : vector<32x1xf32>
    %cst_18 = arith.constant 0.000000e+00 : f32
    %71 = vector.broadcast %cst_18 : f32 to vector<32x1xf32>
    %72 = arith.maximumf %70, %71 : vector<32x1xf32>
    %cst_19 = arith.constant 9.99999974E-6 : f32
    %73 = vector.broadcast %cst_19 : f32 to vector<32x1xf32>
    %74 = arith.addf %72, %73 : vector<32x1xf32>
    %75 = math.rsqrt %74 : vector<32x1xf32>
    %76 = arith.mulf %27, %75 : vector<32x1xf32>
    %77 = arith.mulf %63, %76 : vector<32x1xf32>
    %78 = arith.subf %28, %77 : vector<32x1xf32>
    %79 = vector.broadcast %76 : vector<32x1xf32> to vector<32x128xf32>
    %80 = arith.mulf %59, %79 : vector<32x128xf32>
    %81 = vector.broadcast %78 : vector<32x1xf32> to vector<32x128xf32>
    %82 = arith.addf %80, %81 : vector<32x128xf32>
    %83 = vector.broadcast %5 : vector<32x1xf32> to vector<32x128xf32>
    %84 = arith.mulf %58, %83 : vector<32x128xf32>
    %c2_i32 = arith.constant 2 : i32
    %85 = tpu.dynamic_rotate %58 by %c2_i32 dim 1 : vector<32x128xf32>, i32 -> vector<32x128xf32>
    %86 = vector.broadcast %3 : vector<32x1xf32> to vector<32x128xf32>
    %87 = arith.mulf %85, %86 : vector<32x128xf32>
    %88 = vector.extract_strided_slice %2 {offsets = [3, 0], sizes = [1, 128], strides = [1, 1]} : vector<10x128xf32> to vector<1x128xf32>
    %89 = vector.broadcast %88 : vector<1x128xf32> to vector<32x128xf32>
    %90 = arith.mulf %87, %89 : vector<32x128xf32>
    %91 = arith.addf %84, %90 : vector<32x128xf32>
    %c1_i32 = arith.constant 1 : i32
    %92 = tpu.dynamic_rotate %58 by %c1_i32 dim 1 : vector<32x128xf32>, i32 -> vector<32x128xf32>
    %93 = vector.broadcast %4 : vector<32x1xf32> to vector<32x128xf32>
    %94 = arith.mulf %92, %93 : vector<32x128xf32>
    %95 = vector.extract_strided_slice %2 {offsets = [4, 0], sizes = [1, 128], strides = [1, 1]} : vector<10x128xf32> to vector<1x128xf32>
    %96 = vector.broadcast %95 : vector<1x128xf32> to vector<32x128xf32>
    %97 = arith.mulf %94, %96 : vector<32x128xf32>
    %98 = arith.addf %91, %97 : vector<32x128xf32>
    %c127_i32 = arith.constant 127 : i32
    %99 = tpu.dynamic_rotate %58 by %c127_i32 dim 1 : vector<32x128xf32>, i32 -> vector<32x128xf32>
    %100 = vector.broadcast %6 : vector<32x1xf32> to vector<32x128xf32>
    %101 = arith.mulf %99, %100 : vector<32x128xf32>
    %102 = vector.extract_strided_slice %2 {offsets = [5, 0], sizes = [1, 128], strides = [1, 1]} : vector<10x128xf32> to vector<1x128xf32>
    %103 = vector.broadcast %102 : vector<1x128xf32> to vector<32x128xf32>
    %104 = arith.mulf %101, %103 : vector<32x128xf32>
    %105 = arith.addf %98, %104 : vector<32x128xf32>
    %c126_i32 = arith.constant 126 : i32
    %106 = tpu.dynamic_rotate %58 by %c126_i32 dim 1 : vector<32x128xf32>, i32 -> vector<32x128xf32>
    %107 = vector.broadcast %7 : vector<32x1xf32> to vector<32x128xf32>
    %108 = arith.mulf %106, %107 : vector<32x128xf32>
    %109 = vector.extract_strided_slice %2 {offsets = [6, 0], sizes = [1, 128], strides = [1, 1]} : vector<10x128xf32> to vector<1x128xf32>
    %110 = vector.broadcast %109 : vector<1x128xf32> to vector<32x128xf32>
    %111 = arith.mulf %108, %110 : vector<32x128xf32>
    %112 = arith.addf %105, %111 : vector<32x128xf32>
    %cst_20 = arith.constant dense<0.000000e+00> : vector<32xf32>
    %113 = vector.multi_reduction <add>, %112, %cst_20 [1] : vector<32x128xf32> to vector<32xf32>
    %114 = vector.shape_cast %113 : vector<32xf32> to vector<32x1xf32>
    %cst_21 = arith.constant 1.280000e+02 : f32
    %115 = vector.broadcast %cst_21 : f32 to vector<32x1xf32>
    %116 = arith.divf %114, %115 : vector<32x1xf32>
    %117 = arith.mulf %112, %112 : vector<32x128xf32>
    %cst_22 = arith.constant dense<0.000000e+00> : vector<32xf32>
    %118 = vector.multi_reduction <add>, %117, %cst_22 [1] : vector<32x128xf32> to vector<32xf32>
    %119 = vector.shape_cast %118 : vector<32xf32> to vector<32x1xf32>
    %cst_23 = arith.constant 1.280000e+02 : f32
    %120 = vector.broadcast %cst_23 : f32 to vector<32x1xf32>
    %121 = arith.divf %119, %120 : vector<32x1xf32>
    %122 = arith.mulf %116, %116 : vector<32x1xf32>
    %123 = arith.subf %121, %122 : vector<32x1xf32>
    %cst_24 = arith.constant 0.000000e+00 : f32
    %124 = vector.broadcast %cst_24 : f32 to vector<32x1xf32>
    %125 = arith.maximumf %123, %124 : vector<32x1xf32>
    %cst_25 = arith.constant 9.99999974E-6 : f32
    %126 = vector.broadcast %cst_25 : f32 to vector<32x1xf32>
    %127 = arith.addf %125, %126 : vector<32x1xf32>
    %128 = math.rsqrt %127 : vector<32x1xf32>
    %129 = arith.mulf %17, %128 : vector<32x1xf32>
    %130 = arith.mulf %116, %129 : vector<32x1xf32>
    %131 = arith.subf %18, %130 : vector<32x1xf32>
    %132 = vector.broadcast %129 : vector<32x1xf32> to vector<32x128xf32>
    %133 = arith.mulf %112, %132 : vector<32x128xf32>
    %134 = vector.broadcast %131 : vector<32x1xf32> to vector<32x128xf32>
    %135 = arith.addf %133, %134 : vector<32x128xf32>
    %cst_26 = arith.constant 0.000000e+00 : f32
    %136 = vector.broadcast %cst_26 : f32 to vector<32x128xf32>
    %137 = arith.maximumf %135, %136 : vector<32x128xf32>
    %138 = vector.broadcast %11 : vector<32x1xf32> to vector<32x128xf32>
    %139 = arith.mulf %137, %138 : vector<32x128xf32>
    %c9_i32 = arith.constant 9 : i32
    %140 = tpu.dynamic_rotate %137 by %c9_i32 dim 1 : vector<32x128xf32>, i32 -> vector<32x128xf32>
    %141 = vector.broadcast %8 : vector<32x1xf32> to vector<32x128xf32>
    %142 = arith.mulf %140, %141 : vector<32x128xf32>
    %143 = vector.extract_strided_slice %2 {offsets = [0, 0], sizes = [1, 128], strides = [1, 1]} : vector<10x128xf32> to vector<1x128xf32>
    %144 = vector.broadcast %143 : vector<1x128xf32> to vector<32x128xf32>
    %145 = arith.mulf %142, %144 : vector<32x128xf32>
    %146 = arith.addf %139, %145 : vector<32x128xf32>
    %c6_i32 = arith.constant 6 : i32
    %147 = tpu.dynamic_rotate %137 by %c6_i32 dim 1 : vector<32x128xf32>, i32 -> vector<32x128xf32>
    %148 = vector.broadcast %9 : vector<32x1xf32> to vector<32x128xf32>
    %149 = arith.mulf %147, %148 : vector<32x128xf32>
    %150 = vector.extract_strided_slice %2 {offsets = [1, 0], sizes = [1, 128], strides = [1, 1]} : vector<10x128xf32> to vector<1x128xf32>
    %151 = vector.broadcast %150 : vector<1x128xf32> to vector<32x128xf32>
    %152 = arith.mulf %149, %151 : vector<32x128xf32>
    %153 = arith.addf %146, %152 : vector<32x128xf32>
    %c3_i32 = arith.constant 3 : i32
    %154 = tpu.dynamic_rotate %137 by %c3_i32 dim 1 : vector<32x128xf32>, i32 -> vector<32x128xf32>
    %155 = vector.broadcast %10 : vector<32x1xf32> to vector<32x128xf32>
    %156 = arith.mulf %154, %155 : vector<32x128xf32>
    %157 = vector.extract_strided_slice %2 {offsets = [2, 0], sizes = [1, 128], strides = [1, 1]} : vector<10x128xf32> to vector<1x128xf32>
    %158 = vector.broadcast %157 : vector<1x128xf32> to vector<32x128xf32>
    %159 = arith.mulf %156, %158 : vector<32x128xf32>
    %160 = arith.addf %153, %159 : vector<32x128xf32>
    %c125_i32 = arith.constant 125 : i32
    %161 = tpu.dynamic_rotate %137 by %c125_i32 dim 1 : vector<32x128xf32>, i32 -> vector<32x128xf32>
    %162 = vector.broadcast %12 : vector<32x1xf32> to vector<32x128xf32>
    %163 = arith.mulf %161, %162 : vector<32x128xf32>
    %164 = vector.extract_strided_slice %2 {offsets = [7, 0], sizes = [1, 128], strides = [1, 1]} : vector<10x128xf32> to vector<1x128xf32>
    %165 = vector.broadcast %164 : vector<1x128xf32> to vector<32x128xf32>
    %166 = arith.mulf %163, %165 : vector<32x128xf32>
    %167 = arith.addf %160, %166 : vector<32x128xf32>
    %c122_i32 = arith.constant 122 : i32
    %168 = tpu.dynamic_rotate %137 by %c122_i32 dim 1 : vector<32x128xf32>, i32 -> vector<32x128xf32>
    %169 = vector.broadcast %13 : vector<32x1xf32> to vector<32x128xf32>
    %170 = arith.mulf %168, %169 : vector<32x128xf32>
    %171 = vector.extract_strided_slice %2 {offsets = [8, 0], sizes = [1, 128], strides = [1, 1]} : vector<10x128xf32> to vector<1x128xf32>
    %172 = vector.broadcast %171 : vector<1x128xf32> to vector<32x128xf32>
    %173 = arith.mulf %170, %172 : vector<32x128xf32>
    %174 = arith.addf %167, %173 : vector<32x128xf32>
    %c119_i32 = arith.constant 119 : i32
    %175 = tpu.dynamic_rotate %137 by %c119_i32 dim 1 : vector<32x128xf32>, i32 -> vector<32x128xf32>
    %176 = vector.broadcast %14 : vector<32x1xf32> to vector<32x128xf32>
    %177 = arith.mulf %175, %176 : vector<32x128xf32>
    %178 = vector.extract_strided_slice %2 {offsets = [9, 0], sizes = [1, 128], strides = [1, 1]} : vector<10x128xf32> to vector<1x128xf32>
    %179 = vector.broadcast %178 : vector<1x128xf32> to vector<32x128xf32>
    %180 = arith.mulf %177, %179 : vector<32x128xf32>
    %181 = arith.addf %174, %180 : vector<32x128xf32>
    %cst_27 = arith.constant dense<0.000000e+00> : vector<32xf32>
    %182 = vector.multi_reduction <add>, %181, %cst_27 [1] : vector<32x128xf32> to vector<32xf32>
    %183 = vector.shape_cast %182 : vector<32xf32> to vector<32x1xf32>
    %cst_28 = arith.constant 1.280000e+02 : f32
    %184 = vector.broadcast %cst_28 : f32 to vector<32x1xf32>
    %185 = arith.divf %183, %184 : vector<32x1xf32>
    %186 = arith.mulf %181, %181 : vector<32x128xf32>
    %cst_29 = arith.constant dense<0.000000e+00> : vector<32xf32>
    %187 = vector.multi_reduction <add>, %186, %cst_29 [1] : vector<32x128xf32> to vector<32xf32>
    %188 = vector.shape_cast %187 : vector<32xf32> to vector<32x1xf32>
    %cst_30 = arith.constant 1.280000e+02 : f32
    %189 = vector.broadcast %cst_30 : f32 to vector<32x1xf32>
    %190 = arith.divf %188, %189 : vector<32x1xf32>
    %191 = arith.mulf %185, %185 : vector<32x1xf32>
    %192 = arith.subf %190, %191 : vector<32x1xf32>
    %cst_31 = arith.constant 0.000000e+00 : f32
    %193 = vector.broadcast %cst_31 : f32 to vector<32x1xf32>
    %194 = arith.maximumf %192, %193 : vector<32x1xf32>
    %cst_32 = arith.constant 9.99999974E-6 : f32
    %195 = vector.broadcast %cst_32 : f32 to vector<32x1xf32>
    %196 = arith.addf %194, %195 : vector<32x1xf32>
    %197 = math.rsqrt %196 : vector<32x1xf32>
    %198 = arith.mulf %19, %197 : vector<32x1xf32>
    %199 = arith.mulf %185, %198 : vector<32x1xf32>
    %200 = arith.subf %20, %199 : vector<32x1xf32>
    %201 = vector.broadcast %198 : vector<32x1xf32> to vector<32x128xf32>
    %202 = arith.mulf %181, %201 : vector<32x128xf32>
    %203 = vector.broadcast %200 : vector<32x1xf32> to vector<32x128xf32>
    %204 = arith.addf %202, %203 : vector<32x128xf32>
    %cst_33 = arith.constant 0.000000e+00 : f32
    %205 = vector.broadcast %cst_33 : f32 to vector<32x128xf32>
    %206 = arith.maximumf %204, %205 : vector<32x128xf32>
    %c0_34 = arith.constant 0 : index
    %c0_35 = arith.constant 0 : index
    %207 = vector.load %arg3[%c0_34, %c0_35] : memref<32x32xf32, #tpu.memory_space<vmem>>, vector<32x32xf32>
    %cst_36 = arith.constant dense<0.000000e+00> : vector<32x128xf32>
    %208 = tpu.matmul %207, %206, %cst_36 {dimension_numbers = #tpu.dot_dimension_numbers<[1], [0], [0], [1], [0, 0, 1, 1], [], []>} : vector<32x32xf32>, vector<32x128xf32>, vector<32x128xf32> -> vector<32x128xf32>
    %cst_37 = arith.constant dense<0.000000e+00> : vector<32xf32>
    %209 = vector.multi_reduction <add>, %208, %cst_37 [1] : vector<32x128xf32> to vector<32xf32>
    %210 = vector.shape_cast %209 : vector<32xf32> to vector<32x1xf32>
    %cst_38 = arith.constant 1.280000e+02 : f32
    %211 = vector.broadcast %cst_38 : f32 to vector<32x1xf32>
    %212 = arith.divf %210, %211 : vector<32x1xf32>
    %213 = arith.mulf %208, %208 : vector<32x128xf32>
    %cst_39 = arith.constant dense<0.000000e+00> : vector<32xf32>
    %214 = vector.multi_reduction <add>, %213, %cst_39 [1] : vector<32x128xf32> to vector<32xf32>
    %215 = vector.shape_cast %214 : vector<32xf32> to vector<32x1xf32>
    %cst_40 = arith.constant 1.280000e+02 : f32
    %216 = vector.broadcast %cst_40 : f32 to vector<32x1xf32>
    %217 = arith.divf %215, %216 : vector<32x1xf32>
    %218 = arith.mulf %212, %212 : vector<32x1xf32>
    %219 = arith.subf %217, %218 : vector<32x1xf32>
    %cst_41 = arith.constant 0.000000e+00 : f32
    %220 = vector.broadcast %cst_41 : f32 to vector<32x1xf32>
    %221 = arith.maximumf %219, %220 : vector<32x1xf32>
    %cst_42 = arith.constant 9.99999974E-6 : f32
    %222 = vector.broadcast %cst_42 : f32 to vector<32x1xf32>
    %223 = arith.addf %221, %222 : vector<32x1xf32>
    %224 = math.rsqrt %223 : vector<32x1xf32>
    %225 = arith.mulf %21, %224 : vector<32x1xf32>
    %226 = arith.mulf %212, %225 : vector<32x1xf32>
    %227 = arith.subf %22, %226 : vector<32x1xf32>
    %228 = vector.broadcast %225 : vector<32x1xf32> to vector<32x128xf32>
    %229 = arith.mulf %208, %228 : vector<32x128xf32>
    %230 = vector.broadcast %227 : vector<32x1xf32> to vector<32x128xf32>
    %231 = arith.addf %229, %230 : vector<32x128xf32>
    %cst_43 = arith.constant 0.000000e+00 : f32
    %232 = vector.broadcast %cst_43 : f32 to vector<32x128xf32>
    %233 = arith.maximumf %231, %232 : vector<32x128xf32>
    %234 = arith.mulf %233, %58 : vector<32x128xf32>
    %cst_44 = arith.constant dense<0.000000e+00> : vector<32xf32>
    %235 = vector.multi_reduction <add>, %234, %cst_44 [1] : vector<32x128xf32> to vector<32xf32>
    %236 = vector.shape_cast %235 : vector<32xf32> to vector<32x1xf32>
    %cst_45 = arith.constant 1.280000e+02 : f32
    %237 = vector.broadcast %cst_45 : f32 to vector<32x1xf32>
    %238 = arith.divf %236, %237 : vector<32x1xf32>
    %239 = arith.mulf %234, %234 : vector<32x128xf32>
    %cst_46 = arith.constant dense<0.000000e+00> : vector<32xf32>
    %240 = vector.multi_reduction <add>, %239, %cst_46 [1] : vector<32x128xf32> to vector<32xf32>
    %241 = vector.shape_cast %240 : vector<32xf32> to vector<32x1xf32>
    %cst_47 = arith.constant 1.280000e+02 : f32
    %242 = vector.broadcast %cst_47 : f32 to vector<32x1xf32>
    %243 = arith.divf %241, %242 : vector<32x1xf32>
    %244 = arith.mulf %238, %238 : vector<32x1xf32>
    %245 = arith.subf %243, %244 : vector<32x1xf32>
    %cst_48 = arith.constant 0.000000e+00 : f32
    %246 = vector.broadcast %cst_48 : f32 to vector<32x1xf32>
    %247 = arith.maximumf %245, %246 : vector<32x1xf32>
    %cst_49 = arith.constant 9.99999974E-6 : f32
    %248 = vector.broadcast %cst_49 : f32 to vector<32x1xf32>
    %249 = arith.addf %247, %248 : vector<32x1xf32>
    %250 = math.rsqrt %249 : vector<32x1xf32>
    %251 = arith.mulf %23, %250 : vector<32x1xf32>
    %252 = arith.mulf %238, %251 : vector<32x1xf32>
    %253 = arith.subf %24, %252 : vector<32x1xf32>
    %254 = vector.broadcast %251 : vector<32x1xf32> to vector<32x128xf32>
    %255 = arith.mulf %234, %254 : vector<32x128xf32>
    %256 = vector.broadcast %253 : vector<32x1xf32> to vector<32x128xf32>
    %257 = arith.addf %255, %256 : vector<32x128xf32>
    %cst_50 = arith.constant 0.000000e+00 : f32
    %258 = vector.broadcast %cst_50 : f32 to vector<32x128xf32>
    %259 = arith.maximumf %257, %258 : vector<32x128xf32>
    %c0_51 = arith.constant 0 : index
    %c0_52 = arith.constant 0 : index
    %260 = vector.load %arg4[%c0_51, %c0_52] : memref<32x32xf32, #tpu.memory_space<vmem>>, vector<32x32xf32>
    %cst_53 = arith.constant dense<0.000000e+00> : vector<32x128xf32>
    %261 = tpu.matmul %260, %259, %cst_53 {dimension_numbers = #tpu.dot_dimension_numbers<[1], [0], [0], [1], [0, 0, 1, 1], [], []>} : vector<32x32xf32>, vector<32x128xf32>, vector<32x128xf32> -> vector<32x128xf32>
    %cst_54 = arith.constant dense<0.000000e+00> : vector<32xf32>
    %262 = vector.multi_reduction <add>, %261, %cst_54 [1] : vector<32x128xf32> to vector<32xf32>
    %263 = vector.shape_cast %262 : vector<32xf32> to vector<32x1xf32>
    %cst_55 = arith.constant 1.280000e+02 : f32
    %264 = vector.broadcast %cst_55 : f32 to vector<32x1xf32>
    %265 = arith.divf %263, %264 : vector<32x1xf32>
    %266 = arith.mulf %261, %261 : vector<32x128xf32>
    %cst_56 = arith.constant dense<0.000000e+00> : vector<32xf32>
    %267 = vector.multi_reduction <add>, %266, %cst_56 [1] : vector<32x128xf32> to vector<32xf32>
    %268 = vector.shape_cast %267 : vector<32xf32> to vector<32x1xf32>
    %cst_57 = arith.constant 1.280000e+02 : f32
    %269 = vector.broadcast %cst_57 : f32 to vector<32x1xf32>
    %270 = arith.divf %268, %269 : vector<32x1xf32>
    %271 = arith.mulf %265, %265 : vector<32x1xf32>
    %272 = arith.subf %270, %271 : vector<32x1xf32>
    %cst_58 = arith.constant 0.000000e+00 : f32
    %273 = vector.broadcast %cst_58 : f32 to vector<32x1xf32>
    %274 = arith.maximumf %272, %273 : vector<32x1xf32>
    %cst_59 = arith.constant 9.99999974E-6 : f32
    %275 = vector.broadcast %cst_59 : f32 to vector<32x1xf32>
    %276 = arith.addf %274, %275 : vector<32x1xf32>
    %277 = math.rsqrt %276 : vector<32x1xf32>
    %278 = arith.mulf %25, %277 : vector<32x1xf32>
    %279 = arith.mulf %265, %278 : vector<32x1xf32>
    %280 = arith.subf %26, %279 : vector<32x1xf32>
    %281 = vector.broadcast %278 : vector<32x1xf32> to vector<32x128xf32>
    %282 = arith.mulf %261, %281 : vector<32x128xf32>
    %283 = vector.broadcast %280 : vector<32x1xf32> to vector<32x128xf32>
    %284 = arith.addf %282, %283 : vector<32x128xf32>
    %c0_60 = arith.constant 0 : index
    %c0_61 = arith.constant 0 : index
    %285 = vector.load %arg7[%c0_60, %c0_61] : memref<128x128xf32, #tpu.memory_space<vmem>>, vector<128x128xf32>
    %cst_62 = arith.constant dense<0.000000e+00> : vector<32x128xf32>
    %286 = tpu.matmul %284, %285, %cst_62 {dimension_numbers = #tpu.dot_dimension_numbers<[1], [0], [0], [1], [0, 0, 1, 1], [], []>} : vector<32x128xf32>, vector<128x128xf32>, vector<32x128xf32> -> vector<32x128xf32>
    %c0_63 = arith.constant 0 : index
    %c0_64 = arith.constant 0 : index
    %287 = vector.load %arg5[%c0_63, %c0_64] : memref<8x32xf32, #tpu.memory_space<vmem>>, vector<8x32xf32>
    %cst_65 = arith.constant dense<0.000000e+00> : vector<8x128xf32>
    %288 = tpu.matmul %287, %286, %cst_65 {dimension_numbers = #tpu.dot_dimension_numbers<[1], [0], [0], [1], [0, 0, 1, 1], [], []>} : vector<8x32xf32>, vector<32x128xf32>, vector<8x128xf32> -> vector<8x128xf32>
    %289 = vector.broadcast %30 : vector<8x1xf32> to vector<8x128xf32>
    %290 = arith.addf %288, %289 : vector<8x128xf32>
    %cst_66 = arith.constant 0.000000e+00 : f32
    %291 = vector.broadcast %cst_66 : f32 to vector<8x128xf32>
    %292 = arith.maximumf %290, %291 : vector<8x128xf32>
    %c0_67 = arith.constant 0 : index
    %c0_68 = arith.constant 0 : index
    %293 = vector.load %arg6[%c0_67, %c0_68] : memref<32x8xf32, #tpu.memory_space<vmem>>, vector<32x8xf32>
    %cst_69 = arith.constant dense<0.000000e+00> : vector<32x128xf32>
    %294 = tpu.matmul %293, %292, %cst_69 {dimension_numbers = #tpu.dot_dimension_numbers<[1], [0], [0], [1], [0, 0, 1, 1], [], []>} : vector<32x8xf32>, vector<8x128xf32>, vector<32x128xf32> -> vector<32x128xf32>
    %295 = vector.broadcast %29 : vector<32x1xf32> to vector<32x128xf32>
    %296 = arith.addf %294, %295 : vector<32x128xf32>
    %297 = arith.negf %296 : vector<32x128xf32>
    %298 = math.exp %297 : vector<32x128xf32>
    %cst_70 = arith.constant 1.000000e+00 : f32
    %299 = vector.broadcast %cst_70 : f32 to vector<32x128xf32>
    %300 = arith.addf %299, %298 : vector<32x128xf32>
    %301 = arith.divf %299, %300 : vector<32x128xf32>
    %302 = arith.mulf %284, %301 : vector<32x128xf32>
    %303 = arith.addf %302, %82 : vector<32x128xf32>
    %cst_71 = arith.constant 0.000000e+00 : f32
    %304 = vector.broadcast %cst_71 : f32 to vector<32x128xf32>
    %305 = arith.maximumf %303, %304 : vector<32x128xf32>
    %c0_72 = arith.constant 0 : index
    %c0_73 = arith.constant 0 : index
    %306 = vector.load %arg9[%c0_72, %c0_73] : memref<32x128xf32, #tpu.memory_space<vmem>>, vector<32x128xf32>
    tpu.vector_store %arg9[%c0_72, %c0_73], %305 {strides = array<i32>} : memref<32x128xf32, #tpu.memory_space<vmem>>, vector<32x128xf32>,
    return
  }
}

</mosaic_0001>

<bundles_post_ra>
// kernel: basic_block.1
= control target key start
LH: loop header
LB: loop body
LE: loop exit
PB: predicated region body
PF: predicated region fallthrough
CT: control target
= control target key end

     0   :  { %vm72_vm0 = vcmask 1043456   ;;  %vm47_vm1 = vcmask 31744   ;;  %v2233_v2 = vmov 0   ;;  %v2234_v3 = vmov 2   ;;  %s2241_s26 = smov 1   ;;  %s2246_s27 = smov 2   ;;  %s3292_s0 = inlined_call_operand.vmem [shape: f32[4,128], index: 0, kind: input, shape index: {}]   ;;  %s3293_s2 = inlined_call_operand.vmem [shape: f32[64,4], index: 2, kind: input, shape index: {}]   ;;  %s3294_s1 = inlined_call_operand.vmem [shape: f32[32,28], index: 1, kind: input, shape index: {}]   ;;  %s3295_s8 = inlined_call_operand.vmem [shape: f32[10,128], index: 8, kind: input, shape index: {}]   ;;  %s3296_s3 = inlined_call_operand.vmem [shape: f32[32,32], index: 3, kind: input, shape index: {}]   ;;  %s3297_s4 = inlined_call_operand.vmem [shape: f32[32,32], index: 4, kind: input, shape index: {}]   ;;  %s3298_s7 = inlined_call_operand.vmem [shape: f32[128,128], index: 7, kind: input, shape index: {}]   ;;  %s3299_s5 = inlined_call_operand.vmem [shape: f32[8,32], index: 5, kind: input, shape index: {}]   ;;  %s3300_s6 = inlined_call_operand.vmem [shape: f32[32,8], index: 6, kind: input, shape index: {}]   ;;  %s3301_s9 = inlined_call_operand.vmem [shape: f32[32,128], index: 9, kind: output, shape index: {}]  }
   0x1   :  { %v32_v0 = vld [vmem:[%s3292_s0] sm:$0xf]  ;;  %2074 = vset.pattern.permute.xlu2 %v2233_v2  ;;  %2075 = vset.pattern.permute.xlu1 %v2234_v3  ;;  %v2331_v4 = vld [vmem:[%s3294_s1 + $0x18] sm:$0xff]  ;;  %v2235_v5 = vmov 1   ;;  %v40_v6 = vld [vmem:[%s3293_s2 + $0x8] sm:$0xff]  ;;  %v2236_v8 = vmov 3  }
   0x2   :  { %v39_v1 = vld [vmem:[%s3293_s2] sm:$0xff]  ;;  %2005 = vmatpush.msk.msra.mxu0 %vm72_vm0, %v32_v0  ;;  %2076 = vset.pattern.permute.xlu0 %v2235_v5  ;;  %v2343_v7 = vld [vmem:[%s3294_s1 + $0x10] sm:$0xff]  ;;  %v2362_v11 = vld [vmem:[%s3294_s1 + $0x8] sm:$0xff]  ;;  %v2237_v13 = vmov 4   ;;  %v2238_v28 = vmov 128.0   ;;  %v2239_v43 = vmov 12  }
   0x3   :  { %2006 = vmatmul.msk.f32.vlgmr.msra.gmra.mxu0 %vm47_vm1, %v39_v1  ;;  %493 = vperm.xlu2 %2074, %v2331_v4   ;;  %v41_v9 = vld [vmem:[%s3293_s2 + $0x10] sm:$0xff]  ;;  %v2356_v10 = vld [vmem:[%s3294_s1] sm:$0xff]  ;;  %v42_v12 = vld [vmem:[%s3293_s2 + $0x18] sm:$0xff]  ;;  %2151 = vrcp.f32 %v2238_v28  ;;  %v2240_v48 = vmov 5   ;;  %s2247_s28 = smov 126   ;;  %s2248_s29 = smov 127  }
   0x4   :  { %465 = vperm.xlu1 %2075, %v2331_v4   ;;  %530 = vperm.xlu0 %2076, %v2331_v4   ;;  %s2254_s13 = smov 3   ;;  %s2255_s14 = smov 9  }
   0x5   :  { %s2256_s0 = smov 6   ;;  %s2257_s15 = smov 125  }
   0x6   :  { %s2258_s16 = smov 122   ;;  %s2259_s17 = smov 119  }
   0x9   :  { %v2152_v31 = vpop.eup %2151 }
   0xa   :  { %v126_v33 = vmul.f32 128.0, %v2152_v31  ;;  %vm130_vm2 = vweird.f32 %v2152_v31 }
   0xb   :  { %2007 = vmatmul.msk.f32.gmra.mxu0 %vm47_vm1, %v40_v6  ;;  %489 = vperm.xlu2 %2074, %v2343_v7  }
   0xc   :  { %2079 = vset.pattern.permute.xlu1 %v2236_v8  ;;  %526 = vperm.xlu0 %2076, %v2343_v7   ;;  %v127_v36 = vsub.f32 1.0, %v126_v33 }
   0xd   :  { %567 = vperm.xlu1 %2079, %v2331_v4  }
   0xe   :  { %v128_v37 = vmul.f32 %v2152_v31, %v127_v36 }
  0x10   :  { %v129_v41 = vadd.f32 %v2152_v31, %v128_v37 }
  0x12   :  { %v2429_v42 = vsel %vm130_vm2, %v2152_v31, %v129_v41 }
  0x13   :  { %2008 = vmatmul.msk.f32.gmra.mxu0 %vm47_vm1, %v41_v9  ;;  %2077 = vset.pattern.permute.xlu2 %v2234_v3 }
  0x14   :  { %460 = vperm.xlu2 %2077, %v2343_v7   ;;  %2080 = vset.pattern.permute.xlu0 %v2234_v3 }
  0x15   :  { %2081 = vset.pattern.permute.xlu1 %v2233_v2  ;;  %455 = vperm.xlu0 %2080, %v2362_v11  }
  0x16   :  { %481 = vperm.xlu1 %2081, %v2356_v10  }
  0x1b   :  { %2009 = vmatmul.msk.f32.gmra.mxu0 %vm47_vm1, %v42_v12 }
  0x1c   :  { %2078 = vset.pattern.permute.xlu2 %v2233_v2 }
  0x1d   :  { %485 = vperm.xlu2 %2078, %v2362_v11   ;;  %2086 = vset.pattern.permute.xlu0 %v2236_v8 }
  0x1e   :  { %2082 = vset.pattern.permute.xlu1 %v2235_v5  ;;  %559 = vperm.xlu0 %2086, %v2362_v11  }
  0x1f   :  { %522 = vperm.xlu1 %2082, %v2362_v11  }
  0x25   :  { %2083 = vset.pattern.permute.xlu2 %v2236_v8 }
  0x26   :  { %563 = vperm.xlu2 %2083, %v2343_v7   ;;  %2087 = vset.pattern.permute.xlu0 %v2237_v13 }
  0x27   :  { %2088 = vset.pattern.permute.xlu1 %v2237_v13 }
  0x2e   :  { %2084 = vset.pattern.permute.xlu2 %v2234_v3 }
  0x2f   :  { %450 = vperm.xlu2 %2084, %v2356_v10  }
  0x37   :  { %2085 = vset.pattern.permute.xlu2 %v2235_v5 }
  0x38   :  { %518 = vperm.xlu2 %2085, %v2356_v10  }
  0x40   :  { %2090 = vset.pattern.permute.xlu2 %v2237_v13 }
  0x5d   :  { %v2398_v21 = vpop.permute.xlu2 %493 }
  0x65   :  { %v2401_v22 = vpop.permute.xlu2 %489 }
  0x6e   :  { %v2403_v23 = vpop.permute.xlu2 %460 }
  0x76   :  { %v2407_v25 = vpop.permute.xlu1 %465  ;;  %v2413_v29 = vpop.permute.xlu0 %530 }
  0x77   :  { %v2405_v24 = vpop.permute.xlu2 %485 }
  0x7e   :  { %v2419_v34 = vpop.permute.xlu0 %526 }
  0x7f   :  { %v2415_v30 = vpop.permute.xlu1 %567 }
  0x80   :  { %v2376_v14 = vpop.f32.mrf.mxu0  ;;  %v2411_v27 = vpop.permute.xlu2 %563 }
  0x81   :  { %117 = vadd.xlane.f32.xlu2 %v2376_v14  ;;  %v136_v15 = vmul.f32 %v2376_v14, %v2376_v14 }
  0x83   :  { %140 = vadd.xlane.f32.xlu1 %v136_v15 }
  0x87   :  { %v2425_v39 = vpop.permute.xlu0 %455 }
  0x88   :  { %v2381_v16 = vpop.f32.mrf.mxu0  ;;  %v2421_v35 = vpop.permute.xlu1 %481 }
  0x89   :  { %v137_v17 = vmul.f32 %v2381_v16, %v2381_v16  ;;  %v2417_v32 = vpop.permute.xlu2 %450 }
  0x8b   :  { %119 = vadd.xlane.f32.xlu1 %v2381_v16  ;;  %142 = vadd.xlane.f32.xlu0 %v137_v17 }
  0x90   :  { %v2386_v18 = vpop.f32.mrf.mxu0  ;;  %v2432_v46 = vpop.permute.xlu0 %559 }
  0x91   :  { %v138_v19 = vmul.f32 %v2386_v18, %v2386_v18  ;;  %v2427_v40 = vpop.permute.xlu1 %522 }
  0x92   :  { %v2423_v38 = vpop.permute.xlu2 %518 }
  0x93   :  { %121 = vadd.xlane.f32.xlu0 %v2386_v18  ;;  %144 = vadd.xlane.f32.xlu2 %v138_v19 }
  0x98   :  { %v2391_v20 = vpop.f32.mrf.mxu0 }
  0x99   :  { %v139_v26 = vmul.f32 %v2391_v20, %v2391_v20 }
  0x9b   :  { %123 = vadd.xlane.f32.xlu0 %v2391_v20 }
  0xa4   :  { %600 = vperm.xlu1 %2088, %v2343_v7  }
  0xab   :  { %596 = vperm.xlu2 %2090, %v2362_v11  }
  0xac   :  { %2089 = vset.pattern.permute.xlu1 %v2236_v8 }
  0xad   :  { %555 = vperm.xlu1 %2089, %v2356_v10  }
  0xaf   :  { %604 = vperm.xlu0 %2087, %v2331_v4  }
  0xb3   :  { %2093 = vset.pattern.permute.xlu2 %v2239_v43 }
  0xb5   :  { %2091 = vset.pattern.permute.xlu1 %v2240_v48 }
  0xb7   :  { %592 = vperm.xlu0 %2087, %v2356_v10  }
  0xbf   :  { %2092 = vset.pattern.permute.xlu0 %v2239_v43 }
  0xd7   :  { %146 = vadd.xlane.f32.xlu1 %v139_v26 }
  0xf0   :  { %825 = vperm.xlu1 %2091, %v2331_v4  }
  0xf4   :  { %v118_v44 = vpop.xlane.xlu2 %117 }
  0xf5   :  { %v132_v45 = vmul.f32 %v2429_v42, %v118_v44 }
  0xf6   :  { %v141_v47 = vpop.xlane.xlu1 %140 }
  0xf7   :  { %v152_v49 = vmul.f32 %v132_v45, %v132_v45  ;;  %v148_v50 = vmul.f32 %v141_v47, %v2429_v42 }
  0xf9   :  { %v156_v51 = vsub.f32 %v148_v50, %v152_v49 }
  0xfb   :  { %v160_v52 = vmax.f32 %v156_v51, 0.0 }
  0xfd   :  { %v164_v53 = vadd.f32 1e-05, %v160_v52 }
  0xfe   :  { %v120_v54 = vpop.xlane.xlu1 %119  ;;  %v143_v55 = vpop.xlane.xlu0 %142 }
  0xff   :  { %2153 = vrsqrt.f32 %v164_v53  ;;  %v133_v56 = vmul.f32 %v2429_v42, %v120_v54  ;;  %v149_v58 = vmul.f32 %v143_v55, %v2429_v42  ;;  %vm174_vm4 = vweird.f32 %v164_v53 }
 0x101   :  { %v153_v57 = vmul.f32 %v133_v56, %v133_v56 }
 0x103   :  { %v157_v59 = vsub.f32 %v149_v58, %v153_v57 }
 0x105   :  { %v2154_v60 = vpop.eup %2153  ;;  %v161_v61 = vmax.f32 %v157_v59, 0.0 }
 0x106   :  { %v169_v62 = vmul.f32 %v2154_v60, %v164_v53  ;;  %v122_v63 = vpop.xlane.xlu0 %121  ;;  %v145_v0 = vpop.xlane.xlu2 %144  ;;  %vm175_vm3 = vweird.f32 %v2154_v60 }
 0x107   :  { %v165_v1 = vadd.f32 1e-05, %v161_v61  ;;  %v134_v2 = vmul.f32 %v2429_v42, %v122_v63  ;;  %v150_v3 = vmul.f32 %v145_v0, %v2429_v42  ;;  %vm176_vm5 = vmor %vm174_vm4, %vm175_vm3 }
 0x108   :  { %v170_v5 = vmul.f32 %v2154_v60, %v169_v62 }
 0x109   :  { %2155 = vrsqrt.f32 %v165_v1  ;;  %v154_v6 = vmul.f32 %v134_v2, %v134_v2  ;;  %vm184_vm7 = vweird.f32 %v165_v1 }
 0x10a   :  { %v171_v8 = vmul.f32 0.5, %v170_v5 }
 0x10b   :  { %v158_v9 = vsub.f32 %v150_v3, %v154_v6  ;;  %v2243_v6 = vmov 13  }
 0x10c   :  { %v172_v12 = vsub.f32 1.5, %v171_v8 }
 0x10d   :  { %v162_v13 = vmax.f32 %v158_v9, 0.0 }
 0x10e   :  { %v173_v15 = vmul.f32 %v2154_v60, %v172_v12  ;;  %v124_v61 = vpop.xlane.xlu0 %123 }
 0x10f   :  { %v2156_v17 = vpop.eup %2155  ;;  %v166_v19 = vadd.f32 1e-05, %v162_v13  ;;  %v135_v62 = vmul.f32 %v2429_v42, %v124_v61 }
 0x110   :  { %v179_v26 = vmul.f32 %v2156_v17, %v165_v1  ;;  %v177_v28 = vsel %vm176_vm5, %v2154_v60, %v173_v15  ;;  %vm185_vm6 = vweird.f32 %v2156_v17  ;;  %v2242_v60 = vmov 8  }
 0x111   :  { %2157 = vrsqrt.f32 %v166_v19  ;;  %v208_v31 = vmul.f32 %v177_v28, %v2356_v10  ;;  %vm186_vm8 = vmor %vm184_vm7, %vm185_vm6  ;;  %vm194_vm10 = vweird.f32 %v166_v19  ;;  %v155_v63 = vmul.f32 %v135_v62, %v135_v62 }
 0x112   :  { %v180_v33 = vmul.f32 %v2156_v17, %v179_v26  ;;  %v2459_v26 = vpop.permute.xlu2 %596 }
 0x113   :  { %238 = vperm.xlu0 %2092, %v208_v31   ;;  %v212_v36 = vmul.f32 %v208_v31, %v132_v45 }
 0x114   :  { %v181_v37 = vmul.f32 0.5, %v180_v33 }
 0x115   :  { %220 = vrot.lane.b32.xlu2 %v212_v36, %s2241_s26 }
 0x116   :  { %v182_v41 = vsub.f32 1.5, %v181_v37  ;;  %v2448_v59 = vpop.permute.xlu1 %600  ;;  %v2244_v37 = vmov 7  }
 0x117   :  { %v2158_v43 = vpop.eup %2157 }
 0x118   :  { %v189_v44 = vmul.f32 %v2158_v43, %v166_v19  ;;  %v183_v47 = vmul.f32 %v2156_v17, %v182_v41  ;;  %vm195_vm9 = vweird.f32 %v2158_v43 }
 0x119   :  { %vm196_vm11 = vmor %vm194_vm10, %vm195_vm9 }
 0x11a   :  { %v190_v49 = vmul.f32 %v2158_v43, %v189_v44  ;;  %v187_v50 = vsel %vm186_vm8, %v2156_v17, %v183_v47 }
 0x11b   :  { %v209_v51 = vmul.f32 %v187_v50, %v2362_v11 }
 0x11c   :  { %v191_v52 = vmul.f32 0.5, %v190_v49 }
 0x11d   :  { %243 = vperm.xlu2 %2093, %v209_v51   ;;  %v213_v53 = vmul.f32 %v209_v51, %v133_v56 }
 0x11e   :  { %v192_v54 = vsub.f32 1.5, %v191_v52 }
 0x11f   :  { %222 = vrot.lane.b32.xlu1 %v213_v53, %s2241_s26  ;;  %v2453_v56 = vpop.permute.xlu1 %555 }
 0x120   :  { %v193_v45 = vmul.f32 %v2158_v43, %v192_v54 }
 0x121   :  { %v2467_v41 = vpop.permute.xlu0 %604 }
 0x122   :  { %v197_v55 = vsel %vm196_vm11, %v2158_v43, %v193_v45  ;;  %v2245_v45 = vmov 6  }
 0x123   :  { %v210_v57 = vmul.f32 %v197_v55, %v2343_v7 }
 0x125   :  { %248 = vperm.xlu2 %2093, %v210_v57   ;;  %v214_v58 = vmul.f32 %v210_v57, %v134_v2 }
 0x127   :  { %224 = vrot.lane.b32.xlu0 %v214_v58, %s2241_s26  ;;  %821 = vperm.xlu1 %2091, %v2343_v7  }
 0x129   :  { %v2469_v43 = vpop.permute.xlu0 %592 }
 0x12d   :  { %2094 = vset.pattern.permute.xlu2 %v2242_v60 }
 0x12f   :  { %2096 = vset.pattern.permute.xlu1 %v2242_v60 }
 0x130   :  { %793 = vperm.xlu1 %2096, %v2343_v7  }
 0x138   :  { %2097 = vset.pattern.permute.xlu1 %v2240_v48 }
 0x139   :  { %817 = vperm.xlu1 %2097, %v2362_v11  }
 0x141   :  { %2099 = vset.pattern.permute.xlu1 %v2243_v6 }
 0x14a   :  { %v147_v0 = vpop.xlane.xlu1 %146 }
 0x14b   :  { %v151_v1 = vmul.f32 %v147_v0, %v2429_v42 }
 0x14d   :  { %v159_v2 = vsub.f32 %v151_v1, %v155_v63 }
 0x14f   :  { %v163_v3 = vmax.f32 %v159_v2, 0.0 }
 0x151   :  { %v167_v5 = vadd.f32 1e-05, %v163_v3 }
 0x153   :  { %2159 = vrsqrt.f32 %v167_v5  ;;  %vm204_vm12 = vweird.f32 %v167_v5 }
 0x159   :  { %v2160_v8 = vpop.eup %2159 }
 0x15a   :  { %v199_v9 = vmul.f32 %v2160_v8, %v167_v5  ;;  %vm205_vm13 = vweird.f32 %v2160_v8 }
 0x15b   :  { %vm206_vm14 = vmor %vm204_vm12, %vm205_vm13 }
 0x15c   :  { %v200_v12 = vmul.f32 %v2160_v8, %v199_v9 }
 0x15e   :  { %v201_v13 = vmul.f32 0.5, %v200_v12 }
 0x160   :  { %v202_v15 = vsub.f32 1.5, %v201_v13 }
 0x162   :  { %v203_v17 = vmul.f32 %v2160_v8, %v202_v15  ;;  %v2471_v44 = vpop.permute.xlu1 %825 }
 0x164   :  { %v207_v19 = vsel %vm206_vm14, %v2160_v8, %v203_v17 }
 0x165   :  { %v211_v28 = vmul.f32 %v207_v19, %v2331_v4 }
 0x167   :  { %253 = vperm.xlu0 %2092, %v211_v28   ;;  %v215_v31 = vmul.f32 %v211_v28, %v135_v62 }
 0x169   :  { %226 = vrot.lane.b32.xlu2 %v215_v31, %s2241_s26 }
 0x16f   :  { %v221_v33 = vpop.permute.xlu2 %220  ;;  %2095 = vset.pattern.permute.xlu0 %v2245_v45 }
 0x170   :  { %v232_v36 = vsub.f32 %v2356_v10, %v221_v33  ;;  %862 = vperm.xlu0 %2095, %v2331_v4  }
 0x171   :  { %797 = vperm.xlu2 %2094, %v2331_v4  }
 0x172   :  { %262 = vperm.xlu1 %2099, %v232_v36  }
 0x177   :  { %v244_v53 = vpop.permute.xlu2 %243 }
 0x178   :  { %858 = vperm.xlu0 %2095, %v2343_v7   ;;  %v257_v5 = vmul.f32 %v244_v53, %v2381_v16 }
 0x179   :  { %2098 = vset.pattern.permute.xlu2 %v2244_v37 }
 0x17a   :  { %899 = vperm.xlu2 %2098, %v2331_v4  }
 0x17f   :  { %v249_v54 = vpop.permute.xlu2 %248 }
 0x180   :  { %2101 = vset.pattern.permute.xlu0 %v2242_v60 }
 0x182   :  { %2100 = vset.pattern.permute.xlu2 %v2243_v6 }
 0x185   :  { %v239_v47 = vpop.permute.xlu0 %238 }
 0x186   :  { %v256_v63 = vmul.f32 %v239_v47, %v2376_v14  ;;  %v258_v14 = vmul.f32 %v249_v54, %v2386_v18 }
 0x191   :  { %v223_v49 = vpop.permute.xlu1 %222 }
 0x192   :  { %v233_v50 = vsub.f32 %v2362_v11, %v223_v49 }
 0x194   :  { %267 = vperm.xlu2 %2100, %v233_v50  }
 0x199   :  { %v225_v51 = vpop.permute.xlu0 %224  ;;  %v2479_v58 = vpop.permute.xlu1 %821 }
 0x19a   :  { %v234_v52 = vsub.f32 %v2343_v7, %v225_v51 }
 0x19c   :  { %272 = vperm.xlu1 %2099, %v234_v52   ;;  %2102 = vset.pattern.permute.xlu2 %v2240_v48 }
 0x1a2   :  { %v2483_v61 = vpop.permute.xlu1 %793 }
 0x1ab   :  { %v2485_v48 = vpop.permute.xlu1 %817 }
 0x1c3   :  { %v227_v55 = vpop.permute.xlu2 %226 }
 0x1c4   :  { %v235_v57 = vsub.f32 %v2331_v4, %v227_v55 }
 0x1c6   :  { %277 = vperm.xlu1 %2099, %v235_v57  }
 0x1cb   :  { %v2487_v62 = vpop.permute.xlu2 %797 }
 0x1ce   :  { %2104 = vset.pattern.permute.xlu1 %v2244_v37 }
 0x1d4   :  { %v2490_v1 = vpop.permute.xlu2 %899 }
 0x1d9   :  { %v254_v18 = vpop.permute.xlu0 %253 }
 0x1da   :  { %v259_v15 = vmul.f32 %v254_v18, %v2391_v20 }
 0x1e2   :  { %v2548_v52 = vpop.permute.xlu0 %862 }
 0x1e4   :  { %v263_v0 = vpop.permute.xlu1 %262 }
 0x1e5   :  { %v280_v2 = vadd.f32 %v263_v0, %v256_v63 }
 0x1e7   :  { %v2492_v3 = vmax.f32 %v280_v2, 0.0 }
 0x1e9   :  { %509 = vrot.lane.b32.xlu1 %v2492_v3, %s2241_s26  ;;  %472 = vrot.lane.b32.xlu2 %v2492_v3, %s2246_s27  ;;  %v468_v53 = vmul.f32 %v2417_v32, %v2492_v3 }
 0x1ee   :  { %v268_v6 = vpop.permute.xlu2 %267 }
 0x1ef   :  { %v281_v8 = vadd.f32 %v268_v6, %v257_v5  ;;  %v2563_v6 = vpop.permute.xlu0 %858 }
 0x1f1   :  { %v2499_v9 = vmax.f32 %v281_v8, 0.0  ;;  %583 = vrot.lane.b32.xlu1 %v2492_v3, %s2247_s28  ;;  %546 = vrot.lane.b32.xlu2 %v2492_v3, %s2248_s29 }
 0x1f3   :  { %585 = vrot.lane.b32.xlu0 %v2499_v9, %s2247_s28 }
 0x1f9   :  { %474 = vrot.lane.b32.xlu1 %v2499_v9, %s2246_s27  ;;  %511 = vrot.lane.b32.xlu2 %v2499_v9, %s2241_s26 }
 0x201   :  { %548 = vrot.lane.b32.xlu1 %v2499_v9, %s2248_s29 }
 0x20e   :  { %v273_v16 = vpop.permute.xlu1 %272 }
 0x20f   :  { %v282_v12 = vadd.f32 %v273_v16, %v258_v14 }
 0x211   :  { %v2510_v13 = vmax.f32 %v282_v12, 0.0 }
 0x213   :  { %587 = vrot.lane.b32.xlu2 %v2510_v13, %s2247_s28  ;;  %513 = vrot.lane.b32.xlu1 %v2510_v13, %s2241_s26 }
 0x214   :  { %476 = vrot.lane.b32.xlu0 %v2510_v13, %s2246_s27 }
 0x21b   :  { %813 = vperm.xlu2 %2102, %v2356_v10   ;;  %895 = vperm.xlu1 %2104, %v2343_v7  }
 0x21c   :  { %550 = vrot.lane.b32.xlu0 %v2510_v13, %s2248_s29 }
 0x223   :  { %2103 = vset.pattern.permute.xlu2 %v2245_v45  ;;  %2105 = vset.pattern.permute.xlu1 %v2242_v60  ;;  %v2537_v60 = vld [vmem:[%s3295_s8] sm:$0xff] }
 0x224   :  { %854 = vperm.xlu2 %2103, %v2362_v11   ;;  %v2540_v31 = vperm.slane %v2537_v60, 3  ;;  %v2545_v49 = vperm.slane %v2537_v60, 4  ;;  %v2554_v55 = vperm.slane %v2537_v60, 5  ;;  %v2558_v63 = vperm.slane %v2537_v60, 6 }
 0x238   :  { %v278_v17 = vpop.permute.xlu1 %277 }
 0x239   :  { %v283_v19 = vadd.f32 %v278_v17, %v259_v15  ;;  %v469_v15 = vmul.f32 %v2425_v39, %v2499_v9 }
 0x23b   :  { %v2523_v28 = vmax.f32 %v283_v19, 0.0 }
 0x23d   :  { %552 = vrot.lane.b32.xlu2 %v2523_v28, %s2248_s29  ;;  %515 = vrot.lane.b32.xlu1 %v2523_v28, %s2241_s26 }
 0x23e   :  { %478 = vrot.lane.b32.xlu0 %v2523_v28, %s2246_s27 }
 0x243   :  { %v473_v20 = vpop.permute.xlu2 %472 }
 0x244   :  { %v496_v33 = vmul.f32 %v2421_v35, %v473_v20 }
 0x245   :  { %589 = vrot.lane.b32.xlu1 %v2523_v28, %s2247_s28 }
 0x246   :  { %789 = vperm.xlu0 %2101, %v2362_v11   ;;  %v501_v47 = vmul.f32 %v2540_v31, %v496_v33 }
 0x24b   :  { %v547_v51 = vpop.permute.xlu2 %546 }
 0x24c   :  { %v570_v35 = vmul.f32 %v2453_v56, %v547_v51 }
 0x24d   :  { %785 = vperm.xlu1 %2105, %v2356_v10  }
 0x24e   :  { %2107 = vset.pattern.permute.xlu0 %v2244_v37 }
 0x253   :  { %v512_v16 = vpop.permute.xlu2 %511 }
 0x255   :  { %2106 = vset.pattern.permute.xlu1 %v2245_v45  ;;  %v505_v45 = vadd.f32 %v501_v47, %v468_v53 }
 0x25b   :  { %v510_v36 = vpop.permute.xlu1 %509 }
 0x25c   :  { %v533_v50 = vmul.f32 %v2423_v38, %v510_v36  ;;  %v575_v38 = vmul.f32 %v2554_v55, %v570_v35  ;;  %v470_v35 = vmul.f32 %v2403_v23, %v2510_v13 }
 0x25e   :  { %v538_v54 = vmul.f32 %v2545_v49, %v533_v50 }
 0x260   :  { %v542_v57 = vadd.f32 %v538_v54, %v505_v45 }
 0x262   :  { %v579_v32 = vadd.f32 %v575_v38, %v542_v57 }
 0x263   :  { %v584_v0 = vpop.permute.xlu1 %583 }
 0x264   :  { %v607_v2 = vmul.f32 %v2469_v43, %v584_v0  ;;  %v534_v43 = vmul.f32 %v2427_v40, %v512_v16 }
 0x265   :  { %v586_v17 = vpop.permute.xlu0 %585 }
 0x266   :  { %v612_v5 = vmul.f32 %v2558_v63, %v607_v2  ;;  %v539_v33 = vmul.f32 %v2545_v49, %v534_v43  ;;  %v608_v36 = vmul.f32 %v2459_v26, %v586_v17 }
 0x268   :  { %v2565_v8 = vadd.f32 %v612_v5, %v579_v32  ;;  %v613_v51 = vmul.f32 %v2558_v63, %v608_v36 }
 0x26a   :  { %620 = vadd.xlane.f32.xlu2 %v2565_v8  ;;  %v632_v18 = vmul.f32 %v2565_v8, %v2565_v8 }
 0x26b   :  { %v475_v14 = vpop.permute.xlu1 %474 }
 0x26c   :  { %v497_v56 = vmul.f32 %v2405_v24, %v475_v14 }
 0x26d   :  { %v588_v0 = vpop.permute.xlu2 %587 }
 0x26e   :  { %v502_v12 = vmul.f32 %v2540_v31, %v497_v56  ;;  %v609_v5 = vmul.f32 %v2448_v59, %v588_v0 }
 0x270   :  { %636 = vadd.xlane.f32.xlu0 %v632_v18  ;;  %v506_v19 = vadd.f32 %v502_v12, %v469_v15  ;;  %v614_v16 = vmul.f32 %v2558_v63, %v609_v5  ;;  %v2252_v5 = vmov 11  }
 0x272   :  { %v543_v47 = vadd.f32 %v539_v33, %v506_v19  ;;  %v471_v33 = vmul.f32 %v2407_v25, %v2523_v28 }
 0x273   :  { %v549_v20 = vpop.permute.xlu1 %548 }
 0x274   :  { %v571_v24 = vmul.f32 %v2432_v46, %v549_v20 }
 0x275   :  { %v2598_v23 = vpop.permute.xlu2 %813 }
 0x276   :  { %v576_v50 = vmul.f32 %v2554_v55, %v571_v24 }
 0x278   :  { %v580_v53 = vadd.f32 %v576_v50, %v543_v47 }
 0x27a   :  { %v2580_v40 = vadd.f32 %v613_v51, %v580_v53 }
 0x27c   :  { %622 = vadd.xlane.f32.xlu2 %v2580_v40  ;;  %v633_v39 = vmul.f32 %v2580_v40, %v2580_v40 }
 0x27e   :  { %638 = vadd.xlane.f32.xlu1 %v633_v39  ;;  %v2604_v43 = vpop.permute.xlu2 %854 }
 0x285   :  { %v514_v26 = vpop.permute.xlu1 %513 }
 0x286   :  { %v477_v54 = vpop.permute.xlu0 %476  ;;  %v535_v57 = vmul.f32 %v2419_v34, %v514_v26 }
 0x287   :  { %v498_v45 = vmul.f32 %v2401_v22, %v477_v54 }
 0x288   :  { %v540_v32 = vmul.f32 %v2545_v49, %v535_v57 }
 0x289   :  { %v503_v46 = vmul.f32 %v2540_v31, %v498_v45 }
 0x28b   :  { %v507_v38 = vadd.f32 %v503_v46, %v470_v35 }
 0x28d   :  { %v544_v56 = vadd.f32 %v540_v32, %v507_v38  ;;  %v2602_v59 = vpop.permute.xlu1 %895  ;;  %v2251_v38 = vmov 14  }
 0x28e   :  { %v551_v2 = vpop.permute.xlu0 %550 }
 0x28f   :  { %v572_v14 = vmul.f32 %v2411_v27, %v551_v2 }
 0x291   :  { %v577_v22 = vmul.f32 %v2554_v55, %v572_v14 }
 0x293   :  { %v581_v12 = vadd.f32 %v577_v22, %v544_v56 }
 0x295   :  { %v2595_v18 = vadd.f32 %v614_v16, %v581_v12 }
 0x297   :  { %624 = vadd.xlane.f32.xlu1 %v2595_v18  ;;  %v634_v34 = vmul.f32 %v2595_v18, %v2595_v18  ;;  %v553_v17 = vpop.permute.xlu2 %552 }
 0x298   :  { %v573_v24 = vmul.f32 %v2415_v30, %v553_v17  ;;  %v2249_v30 = vmov 9  }
 0x299   :  { %2109 = vset.pattern.permute.xlu2 %v2249_v30 }
 0x29a   :  { %v578_v39 = vmul.f32 %v2554_v55, %v573_v24 }
 0x29f   :  { %640 = vadd.xlane.f32.xlu1 %v634_v34 }
 0x2af   :  { %v516_v27 = vpop.permute.xlu1 %515 }
 0x2b0   :  { %v479_v15 = vpop.permute.xlu0 %478  ;;  %v536_v20 = vmul.f32 %v2413_v29, %v516_v27 }
 0x2b1   :  { %v499_v19 = vmul.f32 %v2398_v21, %v479_v15 }
 0x2b2   :  { %v541_v50 = vmul.f32 %v2545_v49, %v536_v20  ;;  %v2250_v49 = vmov 10  }
 0x2b3   :  { %v504_v36 = vmul.f32 %v2540_v31, %v499_v19 }
 0x2b5   :  { %v508_v47 = vadd.f32 %v504_v36, %v471_v33 }
 0x2b7   :  { %v545_v51 = vadd.f32 %v541_v50, %v508_v47  ;;  %v590_v53 = vpop.permute.xlu1 %589 }
 0x2b8   :  { %v610_v54 = vmul.f32 %v2467_v41, %v590_v53  ;;  %850 = vperm.xlu1 %2106, %v2356_v10   ;;  %v2627_v41 = vpop.permute.xlu0 %789 }
 0x2b9   :  { %v582_v29 = vadd.f32 %v578_v39, %v545_v51 }
 0x2ba   :  { %v615_v21 = vmul.f32 %v2558_v63, %v610_v54 }
 0x2bc   :  { %v2617_v45 = vadd.f32 %v615_v21, %v582_v29 }
 0x2be   :  { %626 = vadd.xlane.f32.xlu2 %v2617_v45  ;;  %v635_v25 = vmul.f32 %v2617_v45, %v2617_v45 }
 0x2bf   :  { %v2637_v57 = vpop.permute.xlu1 %785 }
 0x2c0   :  { %642 = vadd.xlane.f32.xlu0 %v635_v25  ;;  %2111 = vset.pattern.permute.xlu1 %v2244_v37 }
 0x2c1   :  { %887 = vperm.xlu1 %2111, %v2356_v10  }
 0x2c9   :  { %2113 = vset.pattern.permute.xlu1 %v2251_v38 }
 0x2d4   :  { %891 = vperm.xlu0 %2107, %v2362_v11  }
 0x2d6   :  { %932 = vperm.xlu2 %2109, %v2343_v7  }
 0x2dc   :  { %2108 = vset.pattern.permute.xlu0 %v2249_v30 }
 0x2dd   :  { %v621_v31 = vpop.xlane.xlu2 %620  ;;  %936 = vperm.xlu0 %2108, %v2331_v4  }
 0x2de   :  { %2110 = vset.pattern.permute.xlu2 %v2250_v49  ;;  %v628_v37 = vmul.f32 %v621_v31, %v2429_v42 }
 0x2df   :  { %973 = vperm.xlu2 %2110, %v2331_v4  }
 0x2e0   :  { %v648_v63 = vmul.f32 %v628_v37, %v628_v37 }
 0x2e3   :  { %v637_v55 = vpop.xlane.xlu0 %636 }
 0x2e4   :  { %v644_v26 = vmul.f32 %v637_v55, %v2429_v42 }
 0x2e5   :  { %928 = vperm.xlu0 %2108, %v2362_v11  }
 0x2e6   :  { %v652_v46 = vsub.f32 %v644_v26, %v648_v63 }
 0x2e7   :  { %969 = vperm.xlu2 %2110, %v2343_v7  }
 0x2e8   :  { %v656_v35 = vmax.f32 %v652_v46, 0.0 }
 0x2ea   :  { %v660_v0 = vadd.f32 1e-05, %v656_v35 }
 0x2ec   :  { %2161 = vrsqrt.f32 %v660_v0  ;;  %vm670_vm0 = vweird.f32 %v660_v0 }
 0x2ed   :  { %2115 = vset.pattern.permute.xlu0 %v2250_v49 }
 0x2ef   :  { %v623_v2 = vpop.xlane.xlu2 %622  ;;  %2112 = vset.pattern.permute.xlu2 %v2252_v5 }
 0x2f0   :  { %v629_v32 = vmul.f32 %v623_v2, %v2429_v42  ;;  %1010 = vperm.xlu2 %2112, %v2331_v4  }
 0x2f1   :  { %v639_v14 = vpop.xlane.xlu1 %638 }
 0x2f2   :  { %v2162_v56 = vpop.eup %2161  ;;  %v649_v22 = vmul.f32 %v629_v32, %v629_v32  ;;  %v645_v16 = vmul.f32 %v639_v14, %v2429_v42 }
 0x2f3   :  { %v665_v12 = vmul.f32 %v2162_v56, %v660_v0  ;;  %vm671_vm15 = vweird.f32 %v2162_v56 }
 0x2f4   :  { %v653_v34 = vsub.f32 %v645_v16, %v649_v22  ;;  %vm672_vm2 = vmor %vm670_vm0, %vm671_vm15 }
 0x2f5   :  { %v666_v27 = vmul.f32 %v2162_v56, %v665_v12 }
 0x2f6   :  { %v657_v15 = vmax.f32 %v653_v34, 0.0 }
 0x2f7   :  { %v667_v17 = vmul.f32 0.5, %v666_v27 }
 0x2f8   :  { %v661_v19 = vadd.f32 1e-05, %v657_v15 }
 0x2f9   :  { %v668_v20 = vsub.f32 1.5, %v667_v17 }
 0x2fa   :  { %2163 = vrsqrt.f32 %v661_v19  ;;  %vm680_vm4 = vweird.f32 %v661_v19 }
 0x2fb   :  { %v669_v33 = vmul.f32 %v2162_v56, %v668_v20 }
 0x2fd   :  { %v673_v36 = vsel %vm672_vm2, %v2162_v56, %v669_v33 }
 0x2fe   :  { %v704_v24 = vmul.f32 %v673_v36, %v2356_v10 }
 0x300   :  { %v2164_v47 = vpop.eup %2163  ;;  %v708_v50 = vmul.f32 %v704_v24, %v628_v37 }
 0x301   :  { %v675_v51 = vmul.f32 %v2164_v47, %v661_v19  ;;  %vm681_vm3 = vweird.f32 %v2164_v47 }
 0x302   :  { %716 = vrot.lane.b32.xlu2 %v708_v50, %s2241_s26  ;;  %vm682_vm5 = vmor %vm680_vm4, %vm681_vm3 }
 0x303   :  { %v676_v53 = vmul.f32 %v2164_v47, %v675_v51  ;;  %v2253_v51 = vmov 15  }
 0x305   :  { %v677_v39 = vmul.f32 0.5, %v676_v53 }
 0x307   :  { %v678_v54 = vsub.f32 1.5, %v677_v39 }
 0x309   :  { %v679_v21 = vmul.f32 %v2164_v47, %v678_v54 }
 0x30a   :  { %v625_v29 = vpop.xlane.xlu1 %624  ;;  %1006 = vperm.xlu2 %2112, %v2343_v7  }
 0x30b   :  { %v683_v25 = vsel %vm682_vm5, %v2164_v47, %v679_v21  ;;  %v630_v37 = vmul.f32 %v625_v29, %v2429_v42 }
 0x30c   :  { %v705_v31 = vmul.f32 %v683_v25, %v2362_v11 }
 0x30d   :  { %v650_v26 = vmul.f32 %v630_v37, %v630_v37 }
 0x30e   :  { %739 = vperm.xlu1 %2113, %v705_v31   ;;  %v709_v55 = vmul.f32 %v705_v31, %v629_v32 }
 0x310   :  { %718 = vrot.lane.b32.xlu0 %v709_v55, %s2241_s26 }
 0x312   :  { %v641_v63 = vpop.xlane.xlu1 %640  ;;  %2117 = vset.pattern.permute.xlu2 %v2253_v51 }
 0x313   :  { %v646_v46 = vmul.f32 %v641_v63, %v2429_v42 }
 0x315   :  { %v654_v35 = vsub.f32 %v646_v46, %v650_v26 }
 0x317   :  { %v658_v0 = vmax.f32 %v654_v35, 0.0 }
 0x318   :  { %965 = vperm.xlu0 %2115, %v2362_v11  }
 0x319   :  { %v662_v2 = vadd.f32 1e-05, %v658_v0 }
 0x31b   :  { %2165 = vrsqrt.f32 %v662_v2  ;;  %vm690_vm7 = vweird.f32 %v662_v2 }
 0x320   :  { %2116 = vset.pattern.permute.xlu0 %v2251_v38 }
 0x321   :  { %v2166_v14 = vpop.eup %2165  ;;  %734 = vperm.xlu0 %2116, %v704_v24  }
 0x322   :  { %v685_v56 = vmul.f32 %v2166_v14, %v662_v2  ;;  %vm691_vm6 = vweird.f32 %v2166_v14 }
 0x323   :  { %vm692_vm8 = vmor %vm690_vm7, %vm691_vm6 }
 0x324   :  { %v686_v22 = vmul.f32 %v2166_v14, %v685_v56 }
 0x326   :  { %v687_v32 = vmul.f32 0.5, %v686_v22 }
 0x328   :  { %v688_v16 = vsub.f32 1.5, %v687_v32 }
 0x32a   :  { %v689_v12 = vmul.f32 %v2166_v14, %v688_v16  ;;  %v2677_v22 = vpop.permute.xlu1 %850 }
 0x32c   :  { %v693_v34 = vsel %vm692_vm8, %v2166_v14, %v689_v12 }
 0x32d   :  { %v706_v27 = vmul.f32 %v693_v34, %v2343_v7 }
 0x32f   :  { %744 = vperm.xlu1 %2113, %v706_v27   ;;  %v710_v33 = vmul.f32 %v706_v27, %v630_v37 }
 0x331   :  { %v627_v15 = vpop.xlane.xlu2 %626 }
 0x332   :  { %v631_v17 = vmul.f32 %v627_v15, %v2429_v42 }
 0x333   :  { %v643_v19 = vpop.xlane.xlu0 %642  ;;  %v2680_v32 = vpop.permute.xlu1 %887 }
 0x334   :  { %v651_v20 = vmul.f32 %v631_v17, %v631_v17  ;;  %v647_v38 = vmul.f32 %v643_v19, %v2429_v42 }
 0x336   :  { %v655_v36 = vsub.f32 %v647_v38, %v651_v20 }
 0x337   :  { %720 = vrot.lane.b32.xlu1 %v710_v33, %s2241_s26 }
 0x338   :  { %v659_v24 = vmax.f32 %v655_v36, 0.0  ;;  %2114 = vset.pattern.permute.xlu1 %v2249_v30 }
 0x339   :  { %v2657_v47 = vpop.permute.xlu2 %932 }
 0x33a   :  { %v663_v50 = vadd.f32 1e-05, %v659_v24 }
 0x33c   :  { %2167 = vrsqrt.f32 %v663_v50  ;;  %vm700_vm10 = vweird.f32 %v663_v50 }
 0x33f   :  { %924 = vperm.xlu1 %2114, %v2356_v10  }
 0x341   :  { %v2660_v53 = vpop.permute.xlu2 %973 }
 0x342   :  { %v2168_v39 = vpop.eup %2167 }
 0x343   :  { %v695_v54 = vmul.f32 %v2168_v39, %v663_v50  ;;  %vm701_vm9 = vweird.f32 %v2168_v39 }
 0x344   :  { %vm702_vm11 = vmor %vm700_vm10, %vm701_vm9  ;;  %vm1194_vm9 = vcmask 261120  }
 0x345   :  { %v696_v21 = vmul.f32 %v2168_v39, %v695_v54 }
 0x346   :  { %v2670_v0 = vpop.permute.xlu0 %891 }
 0x347   :  { %v697_v29 = vmul.f32 0.5, %v696_v21  ;;  %2118 = vset.pattern.permute.xlu1 %v2253_v51 }
 0x349   :  { %v698_v25 = vsub.f32 1.5, %v697_v29  ;;  %v2662_v31 = vpop.permute.xlu2 %969 }
 0x34b   :  { %v699_v30 = vmul.f32 %v2168_v39, %v698_v25 }
 0x34d   :  { %v703_v55 = vsel %vm702_vm11, %v2168_v39, %v699_v30 }
 0x34e   :  { %v707_v37 = vmul.f32 %v703_v55, %v2331_v4  ;;  %v2753_v55 = vld [vmem:[%s3294_s1 + $0x8] sm:$0xff] }
 0x34f   :  { %v2672_v2 = vpop.permute.xlu0 %936 }
 0x350   :  { %749 = vperm.xlu0 %2116, %v707_v37   ;;  %v711_v63 = vmul.f32 %v707_v37, %v631_v17 }
 0x351   :  { %v2666_v26 = vpop.permute.xlu2 %1010 }
 0x352   :  { %722 = vrot.lane.b32.xlu2 %v711_v63, %s2241_s26 }
 0x357   :  { %v2674_v14 = vpop.permute.xlu0 %928 }
 0x358   :  { %2121 = vset.pattern.permute.xlu0 %v2252_v5 }
 0x35c   :  { %v717_v46 = vpop.permute.xlu2 %716 }
 0x35d   :  { %v728_v35 = vsub.f32 %v2356_v10, %v717_v46 }
 0x35f   :  { %758 = vperm.xlu2 %2117, %v728_v35  }
 0x364   :  { %v2682_v10 = vpop.permute.xlu2 %1006 }
 0x380   :  { %v740_v16 = vpop.permute.xlu1 %739 }
 0x382   :  { %v719_v56 = vpop.permute.xlu0 %718 }
 0x383   :  { %v729_v4 = vsub.f32 %v2362_v11, %v719_v56  ;;  %v2690_v11 = vld [vmem:[%s3294_s1 + $0x18] sm:$0xff] }
 0x385   :  { %763 = vperm.xlu1 %2118, %v729_v4  }
 0x38a   :  { %v2685_v15 = vpop.permute.xlu0 %965 }
 0x38d   :  { %2120 = vset.pattern.permute.xlu1 %v2252_v5 }
 0x393   :  { %v735_v19 = vpop.permute.xlu0 %734 }
 0x394   :  { %v752_v20 = vmul.f32 %v735_v19, %v2565_v8  ;;  %v753_v8 = vmul.f32 %v740_v16, %v2580_v40  ;;  %v832_v19 = vperm.slane %v2537_v60, 0 }
 0x3a1   :  { %v745_v12 = vpop.permute.xlu1 %744 }
 0x3a2   :  { %v754_v51 = vmul.f32 %v745_v12, %v2595_v18 }
 0x3a9   :  { %v721_v34 = vpop.permute.xlu1 %720 }
 0x3aa   :  { %v730_v27 = vsub.f32 %v2343_v7, %v721_v34 }
 0x3ac   :  { %768 = vperm.xlu2 %2117, %v730_v27   ;;  %v723_v17 = vpop.permute.xlu2 %722 }
 0x3ad   :  { %v731_v5 = vsub.f32 %v2690_v11, %v723_v17 }
 0x3b1   :  { %v2707_v7 = vpop.permute.xlu1 %924 }
 0x3b4   :  { %773 = vperm.xlu2 %2117, %v731_v5  }
 0x3b9   :  { %v759_v38 = vpop.permute.xlu2 %758 }
 0x3ba   :  { %v776_v33 = vadd.f32 %v759_v38, %v752_v20 }
 0x3bc   :  { %v2694_v36 = vmax.f32 %v776_v33, 0.0  ;;  %2119 = vset.pattern.permute.xlu2 %v2250_v49 }
 0x3be   :  { %878 = vrot.lane.b32.xlu0 %v2694_v36, %s2254_s13  ;;  %804 = vrot.lane.b32.xlu1 %v2694_v36, %s2255_s14 }
 0x3bf   :  { %841 = vrot.lane.b32.xlu2 %v2694_v36, %s2256_s0 }
 0x3c2   :  { %v750_v40 = vpop.permute.xlu0 %749 }
 0x3c3   :  { %v755_v25 = vmul.f32 %v750_v40, %v2617_v45  ;;  %v2741_v45 = vld [vmem:[%s3294_s1] sm:$0xff]  ;;  %v2777_v40 = vperm.slane %v2537_v60, 2 }
 0x3c6   :  { %915 = vrot.lane.b32.xlu0 %v2694_v36, %s2257_s15  ;;  %952 = vrot.lane.b32.xlu1 %v2694_v36, %s2258_s16 }
 0x3f7   :  { %v764_v49 = vpop.permute.xlu1 %763 }
 0x3f8   :  { %v777_v24 = vadd.f32 %v764_v49, %v753_v8 }
 0x3fa   :  { %v2710_v50 = vmax.f32 %v777_v24, 0.0  ;;  %v869_v24 = vperm.slane %v2537_v60, 1 }
 0x3fc   :  { %843 = vrot.lane.b32.xlu1 %v2710_v50, %s2256_s0  ;;  %806 = vrot.lane.b32.xlu2 %v2710_v50, %s2255_s14 }
 0x404   :  { %880 = vrot.lane.b32.xlu2 %v2710_v50, %s2254_s13 }
 0x406   :  { %v769_v39 = vpop.permute.xlu2 %768 }
 0x407   :  { %v778_v54 = vadd.f32 %v769_v39, %v754_v51 }
 0x409   :  { %v782_v21 = vmax.f32 %v778_v54, 0.0 }
 0x40b   :  { %808 = vrot.lane.b32.xlu0 %v782_v21, %s2255_s14  ;;  %919 = vrot.lane.b32.xlu1 %v782_v21, %s2257_s15  ;;  %v802_v49 = vmul.f32 %v2483_v61, %v782_v21  ;;  %v38_v61 = vld [vmem:[%s3295_s8 + $0x8] sm:$0x3] }
 0x40c   :  { %917 = vrot.lane.b32.xlu2 %v2710_v50, %s2257_s15 }
 0x40e   :  { %v774_v29 = vpop.permute.xlu2 %773 }
 0x40f   :  { %v779_v18 = vadd.f32 %v774_v29, %v755_v25 }
 0x411   :  { %v2728_v30 = vmax.f32 %v779_v18, 0.0 }
 0x413   :  { %882 = vrot.lane.b32.xlu0 %v782_v21, %s2254_s13  ;;  %956 = vrot.lane.b32.xlu1 %v782_v21, %s2258_s16 }
 0x414   :  { %954 = vrot.lane.b32.xlu2 %v2710_v50, %s2258_s16 }
 0x419   :  { %v2757_v37 = vpop.permute.xlu2 %841 }
 0x41b   :  { %810 = vrot.lane.b32.xlu0 %v2728_v30, %s2255_s14  ;;  %993 = vrot.lane.b32.xlu1 %v782_v21, %s2259_s17 }
 0x41c   :  { %845 = vrot.lane.b32.xlu2 %v782_v21, %s2256_s0 }
 0x423   :  { %991 = vrot.lane.b32.xlu0 %v2710_v50, %s2259_s17  ;;  %884 = vrot.lane.b32.xlu1 %v2728_v30, %s2254_s13 }
 0x424   :  { %847 = vrot.lane.b32.xlu2 %v2728_v30, %s2256_s0 }
 0x42b   :  { %998 = vperm.xlu0 %2121, %v2741_v45   ;;  %958 = vrot.lane.b32.xlu1 %v2728_v30, %s2258_s16 }
 0x42c   :  { %921 = vrot.lane.b32.xlu2 %v2728_v30, %s2257_s15 }
 0x430   :  { %v805_v35 = vpop.permute.xlu1 %804  ;;  %v2761_v56 = vpop.permute.xlu0 %878 }
 0x433   :  { %995 = vrot.lane.b32.xlu1 %v2728_v30, %s2259_s17 }
 0x434   :  { %961 = vperm.xlu2 %2119, %v2741_v45  }
 0x438   :  { %v2765_v16 = vpop.permute.xlu1 %952  ;;  %v2767_v12 = vpop.permute.xlu0 %915 }
 0x43b   :  { %1002 = vperm.xlu1 %2120, %v2753_v55  }
 0x43c   :  { %989 = vrot.lane.b32.xlu2 %v2694_v36, %s2259_s17 }
 0x456   :  { %v807_v63 = vpop.permute.xlu2 %806 }
 0x45e   :  { %v2759_v46 = vpop.permute.xlu2 %880 }
 0x466   :  { %v2763_v4 = vpop.permute.xlu2 %917 }
 0x46e   :  { %v2769_v34 = vpop.permute.xlu2 %954  ;;  %v844_v27 = vpop.permute.xlu1 %843 }
 0x476   :  { %v846_v38 = vpop.permute.xlu2 %845 }
 0x477   :  { %v867_v8 = vmul.f32 %v2563_v6, %v846_v38 }
 0x479   :  { %v872_v29 = vmul.f32 %v869_v24, %v867_v8  ;;  %v2790_v8 = vperm.slane %v38_v61, 0 }
 0x47d   :  { %v809_v17 = vpop.permute.xlu0 %808  ;;  %v920_v5 = vpop.permute.xlu1 %919 }
 0x47e   :  { %v830_v20 = vmul.f32 %v2479_v58, %v809_v17  ;;  %v941_v25 = vmul.f32 %v2657_v47, %v920_v5  ;;  %v2782_v58 = vperm.slane %v2537_v60, 7  ;;  %v848_v21 = vpop.permute.xlu2 %847 }
 0x480   :  { %v835_v33 = vmul.f32 %v832_v19, %v830_v20  ;;  %v946_v20 = vmul.f32 %v2782_v58, %v941_v25 }
 0x482   :  { %v839_v51 = vadd.f32 %v835_v33, %v802_v49 }
 0x484   :  { %v876_v17 = vadd.f32 %v872_v29, %v839_v51 }
 0x485   :  { %v883_v39 = vpop.permute.xlu0 %882  ;;  %v957_v54 = vpop.permute.xlu1 %956 }
 0x486   :  { %v904_v18 = vmul.f32 %v2602_v59, %v883_v39  ;;  %v978_v33 = vmul.f32 %v2662_v31, %v957_v54  ;;  %v2792_v59 = vperm.slane %v38_v61, 1  ;;  %v922_v25 = vpop.permute.xlu2 %921  ;;  %v803_v61 = vmul.f32 %v2487_v62, %v2728_v30 }
 0x488   :  { %v909_v6 = vmul.f32 %v2777_v40, %v904_v18  ;;  %v983_v5 = vmul.f32 %v2790_v8, %v978_v33 }
 0x48a   :  { %v913_v38 = vadd.f32 %v909_v6, %v876_v17  ;;  %v828_v6 = vmul.f32 %v2598_v23, %v805_v35 }
 0x48c   :  { %v950_v47 = vadd.f32 %v946_v20, %v913_v38  ;;  %v868_v20 = vmul.f32 %v2548_v52, %v848_v21  ;;  %v801_v52 = vmul.f32 %v2627_v41, %v2710_v50 }
 0x48d   :  { %v994_v60 = vpop.permute.xlu1 %993  ;;  %v811_v29 = vpop.permute.xlu0 %810 }
 0x48e   :  { %v1015_v49 = vmul.f32 %v2682_v10, %v994_v60  ;;  %v987_v51 = vadd.f32 %v983_v5, %v950_v47  ;;  %v831_v17 = vmul.f32 %v2471_v44, %v811_v29  ;;  %v829_v10 = vmul.f32 %v2485_v48, %v807_v63 }
 0x48f   :  { %v866_v44 = vmul.f32 %v2604_v43, %v844_v27  ;;  %v833_v5 = vmul.f32 %v832_v19, %v828_v6  ;;  %v865_v48 = vmul.f32 %v2677_v22, %v2757_v37  ;;  %v942_v43 = vmul.f32 %v2672_v2, %v922_v25 }
 0x490   :  { %v1020_v39 = vmul.f32 %v2792_v59, %v1015_v49  ;;  %v836_v54 = vmul.f32 %v832_v19, %v831_v17  ;;  %v962_v49 = vpop.permute.xlu2 %961  ;;  %v834_v35 = vmul.f32 %v832_v19, %v829_v10  ;;  %v903_v19 = vmul.f32 %v2670_v0, %v2759_v46 }
 0x491   :  { %v871_v30 = vmul.f32 %v869_v24, %v866_v44  ;;  %v870_v17 = vmul.f32 %v869_v24, %v865_v48  ;;  %v902_v22 = vmul.f32 %v2680_v32, %v2761_v56  ;;  %v940_v0 = vmul.f32 %v2674_v14, %v2763_v4 }
 0x492   :  { %v2797_v18 = vadd.f32 %v1020_v39, %v987_v51  ;;  %v840_v60 = vadd.f32 %v836_v54, %v803_v61  ;;  %v873_v51 = vmul.f32 %v869_v24, %v868_v20  ;;  %v838_v39 = vadd.f32 %v834_v35, %v801_v52 }
 0x493   :  { %v976_v46 = vmul.f32 %v962_v49, %v2765_v16  ;;  %v945_v20 = vmul.f32 %v2782_v58, %v940_v0  ;;  %v977_v14 = vmul.f32 %v2685_v15, %v2769_v34 }
 0x494   :  { %1030 = vadd.xlane.f32.xlu2 %v2797_v18  ;;  %v1040_v33 = vmul.f32 %v2797_v18, %v2797_v18  ;;  %v877_v63 = vadd.f32 %v873_v51, %v840_v60  ;;  %v875_v41 = vadd.f32 %v871_v30, %v838_v39 }
 0x495   :  { %v885_v31 = vpop.permute.xlu1 %884  ;;  %v992_v47 = vpop.permute.xlu0 %991  ;;  %v981_v4 = vmul.f32 %v2790_v8, %v976_v46  ;;  %v982_v60 = vmul.f32 %v2790_v8, %v977_v14 }
 0x496   :  { %v905_v38 = vmul.f32 %v2490_v1, %v885_v31  ;;  %v800_v1 = vmul.f32 %v2637_v57, %v2694_v36  ;;  %v939_v57 = vmul.f32 %v2707_v7, %v2767_v12  ;;  %v947_v36 = vmul.f32 %v2782_v58, %v942_v43 }
 0x497   :  { %v907_v7 = vmul.f32 %v2777_v40, %v902_v22  ;;  %v2260_v43 = vmov 16  }
 0x498   :  { %v910_v62 = vmul.f32 %v2777_v40, %v905_v38  ;;  %v837_v21 = vadd.f32 %v833_v5, %v800_v1  ;;  %v944_v56 = vmul.f32 %v2782_v58, %v939_v57  ;;  %v990_v12 = vpop.permute.xlu2 %989  ;;  %2123 = vset.pattern.permute.xlu2 %v2260_v43  ;;  %2122 = vset.pattern.permute.xlu0 %v2260_v43 }
 0x49a   :  { %v914_v29 = vadd.f32 %v910_v62, %v877_v63  ;;  %v874_v50 = vadd.f32 %v870_v17, %v837_v21 }
 0x49c   :  { %1046 = vadd.xlane.f32.xlu2 %v1040_v33  ;;  %v951_v24 = vadd.f32 %v947_v36, %v914_v29  ;;  %v911_v10 = vadd.f32 %v907_v7, %v874_v50  ;;  %v2864_v50 = vld [vmem:[%s3294_s1 + $0x10] sm:$0xff] }
 0x49d   :  { %v959_v23 = vpop.permute.xlu1 %958  ;;  %v999_v37 = vpop.permute.xlu0 %998 }
 0x49e   :  { %v979_v27 = vmul.f32 %v2660_v53, %v959_v23  ;;  %v908_v53 = vmul.f32 %v2777_v40, %v903_v19  ;;  %v1013_v54 = vmul.f32 %v999_v37, %v990_v12 }
 0x4a0   :  { %v984_v2 = vmul.f32 %v2790_v8, %v979_v27  ;;  %v912_v31 = vadd.f32 %v908_v53, %v875_v41  ;;  %v1018_v40 = vmul.f32 %v2792_v59, %v1013_v54 }
 0x4a2   :  { %v988_v6 = vadd.f32 %v984_v2, %v951_v24  ;;  %v949_v33 = vadd.f32 %v945_v20, %v912_v31 }
 0x4a4   :  { %v986_v34 = vadd.f32 %v982_v60, %v949_v33 }
 0x4a5   :  { %v996_v25 = vpop.permute.xlu1 %995 }
 0x4a6   :  { %v1016_v32 = vmul.f32 %v2666_v26, %v996_v25  ;;  %v948_v26 = vadd.f32 %v944_v56, %v911_v10 }
 0x4a8   :  { %v1021_v61 = vmul.f32 %v2792_v59, %v1016_v32  ;;  %v985_v5 = vadd.f32 %v981_v4, %v948_v26 }
 0x4aa   :  { %v2839_v16 = vadd.f32 %v1021_v61, %v988_v6  ;;  %v2845_v58 = vadd.f32 %v1018_v40, %v985_v5 }
 0x4ac   :  { %v1041_v38 = vmul.f32 %v2839_v16, %v2839_v16  ;;  %v1038_v35 = vmul.f32 %v2845_v58, %v2845_v58 }
 0x4ad   :  { %v1003_v44 = vpop.permute.xlu1 %1002 }
 0x4ae   :  { %v1014_v49 = vmul.f32 %v1003_v44, %v992_v47  ;;  %1048 = vadd.xlane.f32.xlu0 %v1041_v38 }
 0x4b0   :  { %v1019_v15 = vmul.f32 %v2792_v59, %v1014_v49 }
 0x4b2   :  { %v2848_v23 = vadd.f32 %v1019_v15, %v986_v34 }
 0x4b4   :  { %1028 = vadd.xlane.f32.xlu1 %v2848_v23  ;;  %v1039_v51 = vmul.f32 %v2848_v23, %v2848_v23 }
 0x4b6   :  { %1042 = vadd.xlane.f32.xlu0 %v1038_v35  ;;  %1044 = vadd.xlane.f32.xlu2 %v1039_v51 }
 0x4bc   :  { %1032 = vadd.xlane.f32.xlu1 %v2839_v16 }
 0x4c4   :  { %1026 = vadd.xlane.f32.xlu1 %v2845_v58 }
 0x507   :  { %v1031_v8 = vpop.xlane.xlu2 %1030 }
 0x508   :  { %v1036_v59 = vmul.f32 %v1031_v8, %v2429_v42 }
 0x50a   :  { %v1056_v62 = vmul.f32 %v1036_v59, %v1036_v59 }
 0x50f   :  { %v1047_v47 = vpop.xlane.xlu2 %1046 }
 0x510   :  { %v1052_v48 = vmul.f32 %v1047_v47, %v2429_v42 }
 0x512   :  { %v1060_v1 = vsub.f32 %v1052_v48, %v1056_v62 }
 0x514   :  { %v1064_v52 = vmax.f32 %v1060_v1, 0.0 }
 0x516   :  { %v1068_v30 = vadd.f32 1e-05, %v1064_v52 }
 0x518   :  { %2169 = vrsqrt.f32 %v1068_v30  ;;  %vm1096_vm13 = vweird.f32 %v1068_v30 }
 0x51e   :  { %v2170_v63 = vpop.eup %2169 }
 0x51f   :  { %v1091_v27 = vmul.f32 %v2170_v63, %v1068_v30  ;;  %vm1097_vm12 = vweird.f32 %v2170_v63 }
 0x520   :  { %vm1098_vm14 = vmor %vm1096_vm13, %vm1097_vm12 }
 0x521   :  { %v1092_v21 = vmul.f32 %v2170_v63, %v1091_v27  ;;  %v1049_v0 = vpop.xlane.xlu0 %1048 }
 0x522   :  { %v1053_v56 = vmul.f32 %v1049_v0, %v2429_v42 }
 0x523   :  { %v1093_v19 = vmul.f32 0.5, %v1092_v21 }
 0x525   :  { %v1094_v39 = vsub.f32 1.5, %v1093_v19 }
 0x527   :  { %v1095_v29 = vmul.f32 %v2170_v63, %v1094_v39  ;;  %v1029_v17 = vpop.xlane.xlu1 %1028 }
 0x528   :  { %v1035_v22 = vmul.f32 %v1029_v17, %v2429_v42 }
 0x529   :  { %v1045_v57 = vpop.xlane.xlu2 %1044  ;;  %v1099_v41 = vsel %vm1098_vm14, %v2170_v63, %v1095_v29  ;;  %v1043_v6 = vpop.xlane.xlu0 %1042 }
 0x52a   :  { %v1055_v36 = vmul.f32 %v1035_v22, %v1035_v22  ;;  %v1051_v2 = vmul.f32 %v1045_v57, %v2429_v42  ;;  %v1112_v53 = vmul.f32 %v2864_v50, %v1099_v41  ;;  %v1050_v26 = vmul.f32 %v1043_v6, %v2429_v42 }
 0x52b   :  { %v2261_v41 = vmov 17  }
 0x52c   :  { %v1059_v37 = vsub.f32 %v1051_v2, %v1055_v36  ;;  %v1116_v25 = vmul.f32 %v1112_v53, %v1036_v59  ;;  %2125 = vset.pattern.permute.xlu1 %v2261_v41 }
 0x52e   :  { %v1063_v46 = vmax.f32 %v1059_v37, 0.0  ;;  %1126 = vrot.lane.b32.xlu2 %v1116_v25, %s2241_s26 }
 0x52f   :  { %v1033_v24 = vpop.xlane.xlu1 %1032 }
 0x530   :  { %v1067_v32 = vadd.f32 1e-05, %v1063_v46  ;;  %v1037_v7 = vmul.f32 %v1033_v24, %v2429_v42 }
 0x532   :  { %2171 = vrsqrt.f32 %v1067_v32  ;;  %v1057_v12 = vmul.f32 %v1037_v7, %v1037_v7  ;;  %vm1086_vm0 = vweird.f32 %v1067_v32 }
 0x534   :  { %v1061_v31 = vsub.f32 %v1053_v56, %v1057_v12 }
 0x536   :  { %v1065_v54 = vmax.f32 %v1061_v31, 0.0  ;;  %1150 = vperm.xlu2 %2123, %v1112_v53  }
 0x537   :  { %v1027_v61 = vpop.xlane.xlu1 %1026 }
 0x538   :  { %v2172_v10 = vpop.eup %2171  ;;  %v1069_v20 = vadd.f32 1e-05, %v1065_v54  ;;  %v1034_v14 = vmul.f32 %v1027_v61, %v2429_v42 }
 0x539   :  { %v1081_v4 = vmul.f32 %v2172_v10, %v1067_v32  ;;  %vm1087_vm15 = vweird.f32 %v2172_v10 }
 0x53a   :  { %2173 = vrsqrt.f32 %v1069_v20  ;;  %v1054_v40 = vmul.f32 %v1034_v14, %v1034_v14  ;;  %vm1088_vm2 = vmor %vm1086_vm0, %vm1087_vm15  ;;  %vm1106_vm4 = vweird.f32 %v1069_v20 }
 0x53b   :  { %v1082_v38 = vmul.f32 %v2172_v10, %v1081_v4 }
 0x53c   :  { %v1058_v33 = vsub.f32 %v1050_v26, %v1054_v40 }
 0x53d   :  { %v1083_v44 = vmul.f32 0.5, %v1082_v38 }
 0x53e   :  { %v1062_v60 = vmax.f32 %v1058_v33, 0.0 }
 0x53f   :  { %v1084_v5 = vsub.f32 1.5, %v1083_v44 }
 0x540   :  { %v2174_v49 = vpop.eup %2173  ;;  %v1066_v15 = vadd.f32 1e-05, %v1062_v60 }
 0x541   :  { %v1101_v34 = vmul.f32 %v2174_v49, %v1069_v20  ;;  %v1085_v35 = vmul.f32 %v2172_v10, %v1084_v5  ;;  %vm1107_vm3 = vweird.f32 %v2174_v49 }
 0x542   :  { %2175 = vrsqrt.f32 %v1066_v15  ;;  %vm1108_vm5 = vmor %vm1106_vm4, %vm1107_vm3  ;;  %vm1076_vm7 = vweird.f32 %v1066_v15 }
 0x543   :  { %v1102_v51 = vmul.f32 %v2174_v49, %v1101_v34  ;;  %v1089_v8 = vsel %vm1088_vm2, %v2172_v10, %v1085_v35 }
 0x544   :  { %v1111_v59 = vmul.f32 %v2753_v55, %v1089_v8 }
 0x545   :  { %v1103_v47 = vmul.f32 0.5, %v1102_v51 }
 0x546   :  { %1145 = vperm.xlu2 %2123, %v1111_v59   ;;  %v1115_v62 = vmul.f32 %v1111_v59, %v1035_v22 }
 0x547   :  { %v1104_v48 = vsub.f32 1.5, %v1103_v47 }
 0x548   :  { %v2176_v1 = vpop.eup %2175  ;;  %1124 = vrot.lane.b32.xlu0 %v1115_v62, %s2241_s26 }
 0x549   :  { %v1105_v52 = vmul.f32 %v2174_v49, %v1104_v48  ;;  %v1071_v30 = vmul.f32 %v2176_v1, %v1066_v15  ;;  %vm1077_vm6 = vweird.f32 %v2176_v1 }
 0x54a   :  { %vm1078_vm8 = vmor %vm1076_vm7, %vm1077_vm6 }
 0x54b   :  { %v1109_v43 = vsel %vm1108_vm5, %v2174_v49, %v1105_v52  ;;  %v1072_v63 = vmul.f32 %v2176_v1, %v1071_v30  ;;  %v1193_v49 = vld [vmem:[%s3296_s3 + $0x18] sm:$0xff] }
 0x54c   :  { %v1113_v27 = vmul.f32 %v2690_v11, %v1109_v43 }
 0x54d   :  { %v1073_v21 = vmul.f32 0.5, %v1072_v63 }
 0x54e   :  { %v1117_v19 = vmul.f32 %v1113_v27, %v1037_v7  ;;  %2124 = vset.pattern.permute.xlu2 %v2261_v41 }
 0x54f   :  { %v1074_v39 = vsub.f32 1.5, %v1073_v21 }
 0x550   :  { %1128 = vrot.lane.b32.xlu1 %v1117_v19, %s2241_s26  ;;  %1155 = vperm.xlu0 %2122, %v1113_v27  }
 0x551   :  { %v1075_v29 = vmul.f32 %v2176_v1, %v1074_v39 }
 0x553   :  { %v1079_v17 = vsel %vm1078_vm8, %v2176_v1, %v1075_v29 }
 0x554   :  { %v1110_v22 = vmul.f32 %v2741_v45, %v1079_v17 }
 0x556   :  { %v1114_v57 = vmul.f32 %v1110_v22, %v1034_v14 }
 0x558   :  { %1122 = vrot.lane.b32.xlu1 %v1114_v57, %s2241_s26  ;;  %1140 = vperm.xlu0 %2122, %v1110_v22  }
 0x588   :  { %v1127_v36 = vpop.permute.xlu2 %1126 }
 0x589   :  { %v1136_v2 = vsub.f32 %v2864_v50, %v1127_v36 }
 0x58b   :  { %1174 = vperm.xlu1 %2125, %v1136_v2  }
 0x590   :  { %v1151_v32 = vpop.permute.xlu2 %1150 }
 0x591   :  { %v1160_v31 = vmul.f32 %v1151_v32, %v2797_v18 }
 0x5a0   :  { %v1146_v7 = vpop.permute.xlu2 %1145 }
 0x5a1   :  { %v1159_v10 = vmul.f32 %v1146_v7, %v2848_v23  ;;  %v1191_v23 = vld [vmem:[%s3296_s3 + $0x8] sm:$0xff]  ;;  %v2262_v7 = vmov 18  }
 0x5ba   :  { %v1125_v53 = vpop.permute.xlu0 %1124 }
 0x5bb   :  { %v1135_v37 = vsub.f32 %v2753_v55, %v1125_v53 }
 0x5bd   :  { %1169 = vperm.xlu2 %2124, %v1135_v37  }
 0x5c2   :  { %v1129_v25 = vpop.permute.xlu1 %1128  ;;  %v1156_v12 = vpop.permute.xlu0 %1155 }
 0x5c3   :  { %v1137_v0 = vsub.f32 %v2690_v11, %v1129_v25  ;;  %v1161_v54 = vmul.f32 %v1156_v12, %v2839_v16  ;;  %v1190_v16 = vld [vmem:[%s3296_s3] sm:$0xff] }
 0x5c5   :  { %1179 = vperm.xlu1 %2125, %v1137_v0   ;;  %2127 = vset.pattern.permute.xlu2 %v2262_v7 }
 0x5ca   :  { %v1123_v46 = vpop.permute.xlu1 %1122  ;;  %v1141_v40 = vpop.permute.xlu0 %1140 }
 0x5cb   :  { %v1134_v24 = vsub.f32 %v2741_v45, %v1123_v46  ;;  %v1158_v33 = vmul.f32 %v1141_v40, %v2845_v58  ;;  %v1192_v58 = vld [vmem:[%s3296_s3 + $0x10] sm:$0xff] }
 0x5cd   :  { %1164 = vperm.xlu1 %2125, %v1134_v24  }
 0x5d5   :  { %2126 = vset.pattern.permute.xlu1 %v2262_v7 }
 0x5fd   :  { %v1175_v56 = vpop.permute.xlu1 %1174 }
 0x5fe   :  { %v1184_v20 = vadd.f32 %v1175_v56, %v1160_v31 }
 0x600   :  { %v1188_v38 = vmax.f32 %v1184_v20, 0.0 }
 0x617   :  { %v1170_v6 = vpop.permute.xlu2 %1169 }
 0x618   :  { %v1183_v4 = vadd.f32 %v1170_v6, %v1159_v10 }
 0x61a   :  { %v1187_v44 = vmax.f32 %v1183_v4, 0.0 }
 0x637   :  { %v1180_v61 = vpop.permute.xlu1 %1179 }
 0x638   :  { %v1185_v14 = vadd.f32 %v1180_v61, %v1161_v54 }
 0x63a   :  { %v1189_v26 = vmax.f32 %v1185_v14, 0.0 }
 0x63c   :  { %1219 = vmatpush.msra.mxu1 %v1189_v26 }
 0x63e   :  { %1220 = vmatpush.msra.mxu1 %v1188_v38 }
 0x63f   :  { %v1165_v60 = vpop.permute.xlu1 %1164 }
 0x640   :  { %v1182_v5 = vadd.f32 %v1165_v60, %v1158_v33  ;;  %1221 = vmatpush.msra.mxu1 %v1187_v44 }
 0x642   :  { %v1186_v18 = vmax.f32 %v1182_v5, 0.0 }
 0x644   :  { %1222 = vmatpush.msra.mxu1 %v1186_v18 }
 0x645   :  { %2014 = vmatmul.msk.f32.vlgmr.msra.gmra.mxu1 %vm1194_vm9, %v1190_v16 }
 0x64d   :  { %2015 = vmatmul.msk.f32.gmra.mxu1 %vm1194_vm9, %v1191_v23 }
 0x655   :  { %2016 = vmatmul.msk.f32.gmra.mxu1 %vm1194_vm9, %v1192_v58 }
 0x65d   :  { %2017 = vmatmul.msk.f32.gmra.mxu1 %vm1194_vm9, %v1193_v49 }
 0x6c2   :  { %v2902_v15 = vpop.f32.mrf.mxu1 }
 0x6c3   :  { %v1248_v47 = vmul.f32 %v2902_v15, %v2902_v15 }
 0x6ca   :  { %v2904_v34 = vpop.f32.mrf.mxu1 }
 0x6cb   :  { %1238 = vadd.xlane.f32.xlu0 %v2904_v34  ;;  %v1249_v62 = vmul.f32 %v2904_v34, %v2904_v34 }
 0x6d2   :  { %v2907_v35 = vpop.f32.mrf.mxu1 }
 0x6d3   :  { %1240 = vadd.xlane.f32.xlu2 %v2907_v35  ;;  %v1250_v51 = vmul.f32 %v2907_v35, %v2907_v35 }
 0x6da   :  { %v2912_v8 = vpop.f32.mrf.mxu1 }
 0x6db   :  { %v1251_v59 = vmul.f32 %v2912_v8, %v2912_v8  ;;  %1256 = vadd.xlane.f32.xlu2 %v1250_v51  ;;  %1242 = vadd.xlane.f32.xlu0 %v2912_v8 }
 0x6dd   :  { %1258 = vadd.xlane.f32.xlu1 %v1251_v59 }
 0x6e3   :  { %1252 = vadd.xlane.f32.xlu2 %v1248_v47  ;;  %1254 = vadd.xlane.f32.xlu0 %v1249_v62 }
 0x6e5   :  { %1236 = vadd.xlane.f32.xlu1 %v2902_v15 }
 0x73e   :  { %v1239_v48 = vpop.xlane.xlu0 %1238 }
 0x73f   :  { %v2935_v41 = vmul.f32 %v1239_v48, %v2429_v42 }
 0x741   :  { %v1265_v25 = vmul.f32 %v2935_v41, %v2935_v41 }
 0x746   :  { %v1241_v1 = vpop.xlane.xlu2 %1240 }
 0x747   :  { %v2923_v52 = vmul.f32 %v1241_v1, %v2429_v42 }
 0x749   :  { %v1266_v63 = vmul.f32 %v2923_v52, %v2923_v52 }
 0x74e   :  { %v1257_v30 = vpop.xlane.xlu2 %1256  ;;  %v1243_v43 = vpop.xlane.xlu0 %1242 }
 0x74f   :  { %v1262_v27 = vmul.f32 %v1257_v30, %v2429_v42  ;;  %v2929_v21 = vmul.f32 %v1243_v43, %v2429_v42 }
 0x750   :  { %v1259_v19 = vpop.xlane.xlu1 %1258 }
 0x751   :  { %v1270_v39 = vsub.f32 %v1262_v27, %v1266_v63  ;;  %v1267_v29 = vmul.f32 %v2929_v21, %v2929_v21  ;;  %v1263_v17 = vmul.f32 %v1259_v19, %v2429_v42 }
 0x753   :  { %v1274_v22 = vmax.f32 %v1270_v39, 0.0  ;;  %v1271_v57 = vsub.f32 %v1263_v17, %v1267_v29 }
 0x755   :  { %v1278_v36 = vadd.f32 1e-05, %v1274_v22  ;;  %v1275_v2 = vmax.f32 %v1271_v57, 0.0 }
 0x756   :  { %v1255_v53 = vpop.xlane.xlu0 %1254  ;;  %v1253_v0 = vpop.xlane.xlu2 %1252 }
 0x757   :  { %2177 = vrsqrt.f32 %v1278_v36  ;;  %v1279_v37 = vadd.f32 1e-05, %v1275_v2  ;;  %v1261_v46 = vmul.f32 %v1255_v53, %v2429_v42  ;;  %v1260_v12 = vmul.f32 %v1253_v0, %v2429_v42 }
 0x758   :  { %v1237_v24 = vpop.xlane.xlu1 %1236  ;;  %vm1306_vm11 = vweird.f32 %v1278_v36 }
 0x759   :  { %2179 = vrsqrt.f32 %v1279_v37  ;;  %v2941_v32 = vmul.f32 %v1237_v24, %v2429_v42  ;;  %v1269_v56 = vsub.f32 %v1261_v46, %v1265_v25  ;;  %vm1316_vm14 = vweird.f32 %v1279_v37 }
 0x75a   :  { %v2263_v25 = vmov 19  }
 0x75b   :  { %v1264_v31 = vmul.f32 %v2941_v32, %v2941_v32  ;;  %v1273_v54 = vmax.f32 %v1269_v56, 0.0  ;;  %2129 = vset.pattern.permute.xlu0 %v2263_v25 }
 0x75d   :  { %v2178_v6 = vpop.eup %2177  ;;  %v1268_v61 = vsub.f32 %v1260_v12, %v1264_v31  ;;  %v1277_v20 = vadd.f32 1e-05, %v1273_v54 }
 0x75e   :  { %v1301_v10 = vmul.f32 %v2178_v6, %v1278_v36  ;;  %vm1307_vm10 = vweird.f32 %v2178_v6 }
 0x75f   :  { %v2180_v14 = vpop.eup %2179  ;;  %v1272_v4 = vmax.f32 %v1268_v61, 0.0  ;;  %2181 = vrsqrt.f32 %v1277_v20  ;;  %vm1308_vm13 = vmor %vm1306_vm11, %vm1307_vm10  ;;  %vm1296_vm2 = vweird.f32 %v1277_v20 }
 0x760   :  { %v1302_v26 = vmul.f32 %v2178_v6, %v1301_v10  ;;  %v1311_v40 = vmul.f32 %v2180_v14, %v1279_v37  ;;  %vm1317_vm12 = vweird.f32 %v2180_v14 }
 0x761   :  { %v1276_v38 = vadd.f32 1e-05, %v1272_v4  ;;  %vm1318_vm15 = vmor %vm1316_vm14, %vm1317_vm12 }
 0x762   :  { %v1303_v33 = vmul.f32 0.5, %v1302_v26  ;;  %v1312_v44 = vmul.f32 %v2180_v14, %v1311_v40 }
 0x763   :  { %2183 = vrsqrt.f32 %v1276_v38  ;;  %vm1286_vm5 = vweird.f32 %v1276_v38 }
 0x764   :  { %v1304_v60 = vsub.f32 1.5, %v1303_v33  ;;  %v1313_v5 = vmul.f32 0.5, %v1312_v44 }
 0x765   :  { %v2182_v18 = vpop.eup %2181 }
 0x766   :  { %v1314_v16 = vsub.f32 1.5, %v1313_v5  ;;  %v1305_v23 = vmul.f32 %v2178_v6, %v1304_v60  ;;  %v1291_v58 = vmul.f32 %v2182_v18, %v1277_v20  ;;  %vm1297_vm0 = vweird.f32 %v2182_v18 }
 0x767   :  { %vm1298_vm3 = vmor %vm1296_vm2, %vm1297_vm0 }
 0x768   :  { %v1315_v49 = vmul.f32 %v2180_v14, %v1314_v16  ;;  %v1309_v51 = vsel %vm1308_vm13, %v2178_v6, %v1305_v23  ;;  %v1292_v47 = vmul.f32 %v2182_v18, %v1291_v58 }
 0x769   :  { %v2184_v59 = vpop.eup %2183  ;;  %v1322_v62 = vmul.f32 %v2864_v50, %v1309_v51 }
 0x76a   :  { %v1281_v48 = vmul.f32 %v2184_v59, %v1276_v38  ;;  %v1319_v1 = vsel %vm1318_vm15, %v2180_v14, %v1315_v49  ;;  %v1293_v30 = vmul.f32 0.5, %v1292_v47  ;;  %vm1287_vm4 = vweird.f32 %v2184_v59 }
 0x76b   :  { %v1326_v43 = vmul.f32 %v1322_v62, %v2923_v52  ;;  %v1323_v63 = vmul.f32 %v2690_v11, %v1319_v1  ;;  %vm1288_vm6 = vmor %vm1286_vm5, %vm1287_vm4 }
 0x76c   :  { %v1282_v27 = vmul.f32 %v2184_v59, %v1281_v48  ;;  %v1294_v19 = vsub.f32 1.5, %v1293_v30 }
 0x76d   :  { %1336 = vrot.lane.b32.xlu0 %v1326_v43, %s2241_s26  ;;  %v1327_v39 = vmul.f32 %v1323_v63, %v2929_v21 }
 0x76e   :  { %v1283_v29 = vmul.f32 0.5, %v1282_v27  ;;  %v1295_v17 = vmul.f32 %v2182_v18, %v1294_v19 }
 0x76f   :  { %1338 = vrot.lane.b32.xlu1 %v1327_v39, %s2241_s26 }
 0x770   :  { %v1284_v22 = vsub.f32 1.5, %v1283_v29  ;;  %v1299_v57 = vsel %vm1298_vm3, %v2182_v18, %v1295_v17 }
 0x771   :  { %v1321_v52 = vmul.f32 %v2753_v55, %v1299_v57 }
 0x772   :  { %v1285_v36 = vmul.f32 %v2184_v59, %v1284_v22 }
 0x773   :  { %v1325_v53 = vmul.f32 %v1321_v52, %v2935_v41 }
 0x774   :  { %v1289_v2 = vsel %vm1288_vm6, %v2184_v59, %v1285_v36 }
 0x775   :  { %v1320_v37 = vmul.f32 %v2741_v45, %v1289_v2  ;;  %1334 = vrot.lane.b32.xlu2 %v1325_v53, %s2241_s26 }
 0x777   :  { %v1324_v21 = vmul.f32 %v1320_v37, %v2941_v32  ;;  %1365 = vperm.xlu1 %2126, %v1323_v63  }
 0x779   :  { %1332 = vrot.lane.b32.xlu0 %v1324_v21, %s2241_s26 }
 0x77d   :  { %1360 = vperm.xlu2 %2127, %v1322_v62  }
 0x77f   :  { %1355 = vperm.xlu1 %2126, %v1321_v52  }
 0x785   :  { %2128 = vset.pattern.permute.xlu2 %v2263_v25 }
 0x787   :  { %1350 = vperm.xlu1 %2126, %v1320_v37  }
 0x7cf   :  { %v1335_v7 = vpop.permute.xlu2 %1334 }
 0x7d0   :  { %v1345_v32 = vsub.f32 %v2753_v55, %v1335_v7 }
 0x7d7   :  { %v1361_v31 = vpop.permute.xlu2 %1360 }
 0x7d8   :  { %v1370_v6 = vmul.f32 %v1361_v31, %v2907_v35 }
 0x7df   :  { %v1337_v0 = vpop.permute.xlu0 %1336 }
 0x7e0   :  { %v1346_v46 = vsub.f32 %v2864_v50, %v1337_v0 }
 0x7e1   :  { %v1339_v24 = vpop.permute.xlu1 %1338 }
 0x7e2   :  { %v1347_v41 = vsub.f32 %v2690_v11, %v1339_v24  ;;  %1384 = vperm.xlu2 %2128, %v1346_v46  }
 0x7e4   :  { %1389 = vperm.xlu0 %2129, %v1347_v41  }
 0x7e9   :  { %v1366_v54 = vpop.permute.xlu1 %1365 }
 0x7ea   :  { %1379 = vperm.xlu2 %2128, %v1345_v32   ;;  %v1371_v33 = vmul.f32 %v1366_v54, %v2912_v8 }
 0x7eb   :  { %v1333_v56 = vpop.permute.xlu0 %1332 }
 0x7ec   :  { %v1344_v12 = vsub.f32 %v2741_v45, %v1333_v56 }
 0x7ee   :  { %1374 = vperm.xlu0 %2129, %v1344_v12  }
 0x7f1   :  { %v1356_v14 = vpop.permute.xlu1 %1355 }
 0x7f2   :  { %v1369_v4 = vmul.f32 %v1356_v14, %v2904_v34 }
 0x7f9   :  { %v1351_v5 = vpop.permute.xlu1 %1350 }
 0x7fa   :  { %v1368_v18 = vmul.f32 %v1351_v5, %v2902_v15 }
 0x83c   :  { %v1385_v61 = vpop.permute.xlu2 %1384 }
 0x83d   :  { %v1394_v10 = vadd.f32 %v1385_v61, %v1370_v6 }
 0x83f   :  { %v1398_v20 = vmax.f32 %v1394_v10, 0.0  ;;  %v2264_v10 = vmov 20  }
 0x840   :  { %2131 = vset.pattern.permute.xlu2 %v2264_v10  ;;  %2130 = vset.pattern.permute.xlu0 %v2264_v10 }
 0x841   :  { %v2964_v11 = vmul.f32 %v1398_v20, %v2510_v13 }
 0x843   :  { %1408 = vadd.xlane.f32.xlu2 %v2964_v11  ;;  %v1418_v35 = vmul.f32 %v2964_v11, %v2964_v11 }
 0x844   :  { %v1380_v26 = vpop.permute.xlu2 %1379 }
 0x845   :  { %v1393_v40 = vadd.f32 %v1380_v26, %v1369_v4 }
 0x847   :  { %v1397_v38 = vmax.f32 %v1393_v40, 0.0 }
 0x849   :  { %v2969_v45 = vmul.f32 %v1397_v38, %v2499_v9 }
 0x84b   :  { %1424 = vadd.xlane.f32.xlu2 %v1418_v35  ;;  %1406 = vadd.xlane.f32.xlu1 %v2969_v45  ;;  %v1417_v8 = vmul.f32 %v2969_v45, %v2969_v45 }
 0x856   :  { %v1390_v13 = vpop.permute.xlu0 %1389 }
 0x857   :  { %v1395_v44 = vadd.f32 %v1390_v13, %v1371_v33 }
 0x859   :  { %v1399_v60 = vmax.f32 %v1395_v44, 0.0 }
 0x85b   :  { %v2976_v34 = vmul.f32 %v1399_v60, %v2523_v28 }
 0x85d   :  { %1410 = vadd.xlane.f32.xlu1 %v2976_v34  ;;  %v1419_v9 = vmul.f32 %v2976_v34, %v2976_v34 }
 0x85f   :  { %1426 = vadd.xlane.f32.xlu0 %v1419_v9 }
 0x860   :  { %v1375_v16 = vpop.permute.xlu0 %1374 }
 0x861   :  { %v1392_v23 = vadd.f32 %v1375_v16, %v1368_v18 }
 0x863   :  { %v1396_v58 = vmax.f32 %v1392_v23, 0.0 }
 0x865   :  { %v2985_v49 = vmul.f32 %v1396_v58, %v2492_v3  ;;  %1422 = vadd.xlane.f32.xlu1 %v1417_v8  ;;  %v3007_v8 = vld [vmem:[%s3294_s1 + $0x18] sm:$0xff] }
 0x867   :  { %1404 = vadd.xlane.f32.xlu0 %v2985_v49  ;;  %v1416_v28 = vmul.f32 %v2985_v49, %v2985_v49 }
 0x869   :  { %1420 = vadd.xlane.f32.xlu2 %v1416_v28 }
 0x8b6   :  { %v1409_v51 = vpop.xlane.xlu2 %1408 }
 0x8b7   :  { %v1414_v15 = vmul.f32 %v1409_v51, %v2429_v42 }
 0x8b9   :  { %v1434_v47 = vmul.f32 %v1414_v15, %v1414_v15 }
 0x8be   :  { %v1425_v59 = vpop.xlane.xlu2 %1424  ;;  %v1407_v3 = vpop.xlane.xlu1 %1406 }
 0x8bf   :  { %v1430_v62 = vmul.f32 %v1425_v59, %v2429_v42  ;;  %v2995_v52 = vmul.f32 %v1407_v3, %v2429_v42 }
 0x8c1   :  { %v1438_v48 = vsub.f32 %v1430_v62, %v1434_v47  ;;  %v1433_v0 = vmul.f32 %v2995_v52, %v2995_v52 }
 0x8c3   :  { %v1442_v1 = vmax.f32 %v1438_v48, 0.0 }
 0x8c5   :  { %v1446_v30 = vadd.f32 1e-05, %v1442_v1 }
 0x8c7   :  { %2185 = vrsqrt.f32 %v1446_v30  ;;  %vm1474_vm8 = vweird.f32 %v1446_v30 }
 0x8cd   :  { %v2186_v43 = vpop.eup %2185 }
 0x8ce   :  { %v1469_v63 = vmul.f32 %v2186_v43, %v1446_v30  ;;  %vm1475_vm7 = vweird.f32 %v2186_v43 }
 0x8cf   :  { %vm1476_vm10 = vmor %vm1474_vm8, %vm1475_vm7 }
 0x8d0   :  { %v1470_v27 = vmul.f32 %v2186_v43, %v1469_v63  ;;  %v1411_v19 = vpop.xlane.xlu1 %1410 }
 0x8d1   :  { %v1415_v39 = vmul.f32 %v1411_v19, %v2429_v42 }
 0x8d2   :  { %v1471_v29 = vmul.f32 0.5, %v1470_v27  ;;  %v1427_v17 = vpop.xlane.xlu0 %1426  ;;  %v3017_v27 = vld [vmem:[%s3294_s1] sm:$0xff] }
 0x8d3   :  { %v1435_v22 = vmul.f32 %v1415_v39, %v1415_v39  ;;  %v1431_v57 = vmul.f32 %v1427_v17, %v2429_v42 }
 0x8d4   :  { %v1472_v36 = vsub.f32 1.5, %v1471_v29 }
 0x8d5   :  { %v1439_v2 = vsub.f32 %v1431_v57, %v1435_v22  ;;  %v3025_v57 = vld [vmem:[%s3294_s1 + $0x8] sm:$0xff] }
 0x8d6   :  { %v1473_v53 = vmul.f32 %v2186_v43, %v1472_v36 }
 0x8d7   :  { %v1443_v37 = vmax.f32 %v1439_v2, 0.0 }
 0x8d8   :  { %v1423_v21 = vpop.xlane.xlu1 %1422  ;;  %v1477_v25 = vsel %vm1476_vm10, %v2186_v43, %v1473_v53 }
 0x8d9   :  { %v1447_v46 = vadd.f32 1e-05, %v1443_v37  ;;  %v1429_v24 = vmul.f32 %v1423_v21, %v2429_v42  ;;  %v1490_v41 = vmul.f32 %v2864_v50, %v1477_v25 }
 0x8da   :  { %v1405_v7 = vpop.xlane.xlu0 %1404 }
 0x8db   :  { %2187 = vrsqrt.f32 %v1447_v46  ;;  %v1437_v32 = vsub.f32 %v1429_v24, %v1433_v0  ;;  %v1412_v56 = vmul.f32 %v1405_v7, %v2429_v42  ;;  %v1494_v31 = vmul.f32 %v1490_v41, %v1414_v15 }
 0x8dc   :  { %v1421_v12 = vpop.xlane.xlu2 %1420  ;;  %vm1484_vm12 = vweird.f32 %v1447_v46 }
 0x8dd   :  { %v1441_v54 = vmax.f32 %v1437_v32, 0.0  ;;  %v1432_v6 = vmul.f32 %v1412_v56, %v1412_v56  ;;  %v1428_v61 = vmul.f32 %v1421_v12, %v2429_v42  ;;  %1504 = vrot.lane.b32.xlu1 %v1494_v31, %s2241_s26 }
 0x8df   :  { %v1445_v20 = vadd.f32 1e-05, %v1441_v54  ;;  %v1436_v14 = vsub.f32 %v1428_v61, %v1432_v6 }
 0x8e1   :  { %v2188_v4 = vpop.eup %2187  ;;  %2189 = vrsqrt.f32 %v1445_v20  ;;  %v1440_v26 = vmax.f32 %v1436_v14, 0.0  ;;  %vm1464_vm15 = vweird.f32 %v1445_v20 }
 0x8e2   :  { %v1479_v40 = vmul.f32 %v2188_v4, %v1447_v46  ;;  %vm1485_vm11 = vweird.f32 %v2188_v4 }
 0x8e3   :  { %v1444_v38 = vadd.f32 1e-05, %v1440_v26  ;;  %vm1486_vm13 = vmor %vm1484_vm12, %vm1485_vm11  ;;  %v1571_v26 = vld [vmem:[%s3297_s4 + $0x18] sm:$0xff] }
 0x8e4   :  { %v1480_v35 = vmul.f32 %v2188_v4, %v1479_v40 }
 0x8e5   :  { %2191 = vrsqrt.f32 %v1444_v38  ;;  %vm1454_vm3 = vweird.f32 %v1444_v38 }
 0x8e6   :  { %v1481_v33 = vmul.f32 0.5, %v1480_v35 }
 0x8e7   :  { %v2190_v13 = vpop.eup %2189 }
 0x8e8   :  { %v1482_v44 = vsub.f32 1.5, %v1481_v33  ;;  %v1459_v60 = vmul.f32 %v2190_v13, %v1445_v20  ;;  %vm1465_vm14 = vweird.f32 %v2190_v13 }
 0x8e9   :  { %vm1466_vm0 = vmor %vm1464_vm15, %vm1465_vm14 }
 0x8ea   :  { %v1483_v5 = vmul.f32 %v2188_v4, %v1482_v44  ;;  %v1460_v9 = vmul.f32 %v2190_v13, %v1459_v60 }
 0x8eb   :  { %v2192_v18 = vpop.eup %2191 }
 0x8ec   :  { %v1461_v16 = vmul.f32 0.5, %v1460_v9  ;;  %v1449_v23 = vmul.f32 %v2192_v18, %v1444_v38  ;;  %v1487_v58 = vsel %vm1486_vm13, %v2188_v4, %v1483_v5  ;;  %vm1455_vm2 = vweird.f32 %v2192_v18  ;;  %v1569_v4 = vld [vmem:[%s3297_s4 + $0x8] sm:$0xff] }
 0x8ed   :  { %v1491_v28 = vmul.f32 %v3007_v8, %v1487_v58  ;;  %vm1456_vm4 = vmor %vm1454_vm3, %vm1455_vm2 }
 0x8ee   :  { %v1462_v51 = vsub.f32 1.5, %v1461_v16  ;;  %v1450_v15 = vmul.f32 %v2192_v18, %v1449_v23 }
 0x8ef   :  { %v1495_v59 = vmul.f32 %v1491_v28, %v1415_v39 }
 0x8f0   :  { %v1463_v47 = vmul.f32 %v2190_v13, %v1462_v51  ;;  %v1451_v62 = vmul.f32 0.5, %v1450_v15 }
 0x8f1   :  { %1506 = vrot.lane.b32.xlu0 %v1495_v59, %s2241_s26 }
 0x8f2   :  { %v1452_v48 = vsub.f32 1.5, %v1451_v62  ;;  %v1467_v1 = vsel %vm1466_vm0, %v2190_v13, %v1463_v47 }
 0x8f3   :  { %v1489_v30 = vmul.f32 %v2753_v55, %v1467_v1  ;;  %v2265_v55 = vmov 21  }
 0x8f4   :  { %v1453_v3 = vmul.f32 %v2192_v18, %v1452_v48  ;;  %2133 = vset.pattern.permute.xlu1 %v2265_v55 }
 0x8f5   :  { %v1493_v43 = vmul.f32 %v1489_v30, %v2995_v52 }
 0x8f6   :  { %v1457_v63 = vsel %vm1456_vm4, %v2192_v18, %v1453_v3 }
 0x8f7   :  { %1502 = vrot.lane.b32.xlu2 %v1493_v43, %s2241_s26  ;;  %v1488_v19 = vmul.f32 %v3017_v27, %v1457_v63 }
 0x8f9   :  { %v1492_v39 = vmul.f32 %v1488_v19, %v1412_v56 }
 0x8fb   :  { %1500 = vrot.lane.b32.xlu0 %v1492_v39, %s2241_s26 }
 0x8ff   :  { %1528 = vperm.xlu2 %2131, %v1490_v41  }
 0x903   :  { %1533 = vperm.xlu0 %2130, %v1491_v28  }
 0x907   :  { %1523 = vperm.xlu2 %2131, %v1489_v30  }
 0x90b   :  { %1518 = vperm.xlu0 %2130, %v1488_v19  }
 0x90f   :  { %2132 = vset.pattern.permute.xlu2 %v2265_v55 }
 0x94f   :  { %v1505_v29 = vpop.permute.xlu1 %1504 }
 0x950   :  { %v1514_v17 = vsub.f32 %v2864_v50, %v1505_v29 }
 0x951   :  { %v1503_v22 = vpop.permute.xlu2 %1502 }
 0x952   :  { %v1513_v36 = vsub.f32 %v3025_v57, %v1503_v22  ;;  %1552 = vperm.xlu1 %2133, %v1514_v17   ;;  %v2266_v22 = vmov 22  }
 0x953   :  { %2134 = vset.pattern.permute.xlu0 %v2266_v22 }
 0x954   :  { %1547 = vperm.xlu2 %2132, %v1513_v36  }
 0x959   :  { %v1529_v21 = vpop.permute.xlu2 %1528 }
 0x95a   :  { %v1538_v46 = vmul.f32 %v1529_v21, %v2964_v11 }
 0x961   :  { %v1524_v50 = vpop.permute.xlu2 %1523 }
 0x962   :  { %v1537_v32 = vmul.f32 %v1524_v50, %v2969_v45  ;;  %v1568_v45 = vld [vmem:[%s3297_s4] sm:$0xff] }
 0x963   :  { %v1507_v52 = vpop.permute.xlu0 %1506 }
 0x964   :  { %v1515_v2 = vsub.f32 %v3007_v8, %v1507_v52 }
 0x966   :  { %1557 = vperm.xlu1 %2133, %v1515_v2  }
 0x96d   :  { %v1501_v53 = vpop.permute.xlu0 %1500 }
 0x96e   :  { %v1512_v37 = vsub.f32 %v3017_v27, %v1501_v53 }
 0x970   :  { %1542 = vperm.xlu1 %2133, %v1512_v37  }
 0x975   :  { %v1534_v0 = vpop.permute.xlu0 %1533 }
 0x976   :  { %v1539_v24 = vmul.f32 %v1534_v0, %v2976_v34 }
 0x978   :  { %2135 = vset.pattern.permute.xlu1 %v2266_v22 }
 0x97d   :  { %v1519_v61 = vpop.permute.xlu0 %1518 }
 0x97e   :  { %v1536_v20 = vmul.f32 %v1519_v61, %v2985_v49  ;;  %v1570_v49 = vld [vmem:[%s3297_s4 + $0x10] sm:$0xff] }
 0x9ae   :  { %v1548_v41 = vpop.permute.xlu2 %1547 }
 0x9af   :  { %v1561_v31 = vadd.f32 %v1548_v41, %v1537_v32 }
 0x9b1   :  { %v1565_v10 = vmax.f32 %v1561_v31, 0.0 }
 0x9c4   :  { %v1553_v25 = vpop.permute.xlu1 %1552 }
 0x9c5   :  { %v1562_v56 = vadd.f32 %v1553_v25, %v1538_v46 }
 0x9c7   :  { %v1566_v6 = vmax.f32 %v1562_v56, 0.0 }
 0x9d8   :  { %v1558_v7 = vpop.permute.xlu1 %1557 }
 0x9d9   :  { %v1563_v12 = vadd.f32 %v1558_v7, %v1539_v24 }
 0x9db   :  { %v1567_v54 = vmax.f32 %v1563_v12, 0.0 }
 0x9dd   :  { %1596 = vmatpush.msrb.mxu1 %v1567_v54  ;;  %2031 = vmatpush.msra.mxu2 %v1567_v54 }
 0x9df   :  { %1597 = vmatpush.msrb.mxu1 %v1566_v6  ;;  %2032 = vmatpush.msra.mxu2 %v1566_v6 }
 0x9e1   :  { %1598 = vmatpush.msrb.mxu1 %v1565_v10  ;;  %2033 = vmatpush.msra.mxu2 %v1565_v10 }
 0x9e2   :  { %v1543_v11 = vpop.permute.xlu1 %1542 }
 0x9e3   :  { %v1560_v34 = vadd.f32 %v1543_v11, %v1536_v20 }
 0x9e5   :  { %v1564_v14 = vmax.f32 %v1560_v34, 0.0 }
 0x9e7   :  { %1599 = vmatpush.msrb.mxu1 %v1564_v14  ;;  %2034 = vmatpush.msra.mxu2 %v1564_v14 }
 0x9e8   :  { %2018 = vmatmul.msk.f32.vlgmr.msrb.gmra.mxu1 %vm1194_vm9, %v1568_v45  ;;  %2019 = vmatmul.msk.f32.vlgmr.msra.gmra.mxu2 %vm1194_vm9, %v1569_v4 }
 0x9f0   :  { %2020 = vmatmul.msk.f32.gmra.mxu2 %vm1194_vm9, %v1570_v49 }
 0x9f8   :  { %2021 = vmatmul.msk.f32.gmra.mxu2 %vm1194_vm9, %v1571_v26 }
 0xa65   :  { %v3050_v40 = vpop.f32.mrf.mxu1 }
 0xa66   :  { %v1625_v38 = vmul.f32 %v3050_v40, %v3050_v40  ;;  %1613 = vadd.xlane.f32.xlu0 %v3050_v40 }
 0xa68   :  { %1629 = vadd.xlane.f32.xlu2 %v1625_v38 }
 0xa6b   :  { %v3055_v35 = vpop.f32.mrf.mxu2 }
 0xa6c   :  { %1615 = vadd.xlane.f32.xlu1 %v3055_v35  ;;  %v1626_v33 = vmul.f32 %v3055_v35, %v3055_v35 }
 0xa70   :  { %1631 = vadd.xlane.f32.xlu2 %v1626_v33 }
 0xa73   :  { %v3060_v13 = vpop.f32.mrf.mxu2 }
 0xa74   :  { %v1627_v44 = vmul.f32 %v3060_v13, %v3060_v13  ;;  %1617 = vadd.xlane.f32.xlu0 %v3060_v13 }
 0xa76   :  { %1633 = vadd.xlane.f32.xlu1 %v1627_v44 }
 0xa7b   :  { %v3065_v60 = vpop.f32.mrf.mxu2 }
 0xa7c   :  { %v1628_v5 = vmul.f32 %v3065_v60, %v3065_v60  ;;  %1619 = vadd.xlane.f32.xlu2 %v3065_v60 }
 0xa7e   :  { %1635 = vadd.xlane.f32.xlu0 %v1628_v5 }
 0xad9   :  { %v1614_v9 = vpop.xlane.xlu0 %1613 }
 0xada   :  { %v1621_v18 = vmul.f32 %v1614_v9, %v2429_v42 }
 0xadb   :  { %v1630_v16 = vpop.xlane.xlu2 %1629 }
 0xadc   :  { %v1641_v23 = vmul.f32 %v1621_v18, %v1621_v18  ;;  %v1637_v58 = vmul.f32 %v1630_v16, %v2429_v42 }
 0xade   :  { %v1645_v28 = vsub.f32 %v1637_v58, %v1641_v23 }
 0xadf   :  { %v1616_v51 = vpop.xlane.xlu1 %1615 }
 0xae0   :  { %v1649_v15 = vmax.f32 %v1645_v28, 0.0  ;;  %v1622_v59 = vmul.f32 %v1616_v51, %v2429_v42  ;;  %v3095_v51 = vld [vmem:[%s3294_s1 + $0x10] sm:$0xff] }
 0xae2   :  { %v1653_v47 = vadd.f32 1e-05, %v1649_v15  ;;  %v1642_v48 = vmul.f32 %v1622_v59, %v1622_v59 }
 0xae3   :  { %v1632_v62 = vpop.xlane.xlu2 %1631 }
 0xae4   :  { %2193 = vrsqrt.f32 %v1653_v47  ;;  %v1638_v1 = vmul.f32 %v1632_v62, %v2429_v42  ;;  %vm1663_vm6 = vweird.f32 %v1653_v47  ;;  %v44_v62 = vld [vmem:[%s3293_s2 + $0x28] sm:$0xff] }
 0xae6   :  { %v1646_v30 = vsub.f32 %v1638_v1, %v1642_v48 }
 0xae7   :  { %v1618_v3 = vpop.xlane.xlu0 %1617 }
 0xae8   :  { %v1650_v43 = vmax.f32 %v1646_v30, 0.0  ;;  %v3075_v63 = vmul.f32 %v1618_v3, %v2429_v42 }
 0xae9   :  { %v1634_v19 = vpop.xlane.xlu1 %1633 }
 0xaea   :  { %v2194_v39 = vpop.eup %2193  ;;  %v1654_v55 = vadd.f32 1e-05, %v1650_v43  ;;  %v1643_v29 = vmul.f32 %v3075_v63, %v3075_v63  ;;  %v1639_v17 = vmul.f32 %v1634_v19, %v2429_v42  ;;  %v46_v19 = vld [vmem:[%s3293_s2 + $0x38] sm:$0xff] }
 0xaeb   :  { %v1658_v36 = vmul.f32 %v2194_v39, %v1653_v47  ;;  %vm1664_vm5 = vweird.f32 %v2194_v39 }
 0xaec   :  { %2195 = vrsqrt.f32 %v1654_v55  ;;  %v1647_v52 = vsub.f32 %v1639_v17, %v1643_v29  ;;  %vm1665_vm7 = vmor %vm1663_vm6, %vm1664_vm5  ;;  %vm1673_vm10 = vweird.f32 %v1654_v55 }
 0xaed   :  { %v1659_v2 = vmul.f32 %v2194_v39, %v1658_v36 }
 0xaee   :  { %v1651_v53 = vmax.f32 %v1647_v52, 0.0 }
 0xaef   :  { %v1660_v37 = vmul.f32 0.5, %v1659_v2  ;;  %v1620_v21 = vpop.xlane.xlu2 %1619 }
 0xaf0   :  { %v1655_v50 = vadd.f32 1e-05, %v1651_v53  ;;  %v1624_v25 = vmul.f32 %v1620_v21, %v2429_v42  ;;  %v1788_v21 = vld [vmem:[%s3298_s7 + $0x78] sm:$0xff] }
 0xaf1   :  { %v1661_v0 = vsub.f32 1.5, %v1660_v37  ;;  %v1636_v46 = vpop.xlane.xlu0 %1635  ;;  %1789 = vmatpush.msra.mxu3 %v1788_v21 }
 0xaf2   :  { %v2196_v24 = vpop.eup %2195  ;;  %2197 = vrsqrt.f32 %v1655_v50  ;;  %v1644_v41 = vmul.f32 %v1624_v25, %v1624_v25  ;;  %v1640_v7 = vmul.f32 %v1636_v46, %v2429_v42  ;;  %vm1683_vm13 = vweird.f32 %v1655_v50  ;;  %v1785_v46 = vld [vmem:[%s3298_s7 + $0x60] sm:$0xff] }
 0xaf3   :  { %v1662_v32 = vmul.f32 %v2194_v39, %v1661_v0  ;;  %v1668_v56 = vmul.f32 %v2196_v24, %v1654_v55  ;;  %vm1674_vm8 = vweird.f32 %v2196_v24 }
 0xaf4   :  { %v1648_v12 = vsub.f32 %v1640_v7, %v1644_v41  ;;  %vm1675_vm11 = vmor %vm1673_vm10, %vm1674_vm8  ;;  %v1783_v41 = vld [vmem:[%s3298_s7 + $0x50] sm:$0xff]  ;;  %v1782_v7 = vld [vmem:[%s3298_s7 + $0x48] sm:$0xff] }
 0xaf5   :  { %v1669_v31 = vmul.f32 %v2196_v24, %v1668_v56  ;;  %v1666_v54 = vsel %vm1665_vm7, %v2194_v39, %v1662_v32  ;;  %v2267_v39 = vmov 23   ;;  %v1781_v32 = vld [vmem:[%s3298_s7 + $0x40] sm:$0xff]  ;;  %v1780_v56 = vld [vmem:[%s3298_s7 + $0x38] sm:$0xff] }
 0xaf6   :  { %v1652_v6 = vmax.f32 %v1648_v12, 0.0  ;;  %v1697_v61 = vmul.f32 %v3017_v27, %v1666_v54  ;;  %2136 = vset.pattern.permute.xlu2 %v2267_v39  ;;  %v1778_v54 = vld [vmem:[%s3298_s7 + $0x28] sm:$0xff] }
 0xaf7   :  { %v1670_v10 = vmul.f32 0.5, %v1669_v31  ;;  %v1779_v31 = vld [vmem:[%s3298_s7 + $0x30] sm:$0xff] }
 0xaf8   :  { %v2198_v20 = vpop.eup %2197  ;;  %v1656_v11 = vadd.f32 1e-05, %v1652_v6  ;;  %v1701_v34 = vmul.f32 %v1697_v61, %v1621_v18  ;;  %v43_v18 = vld [vmem:[%s3293_s2 + $0x20] sm:$0xff] }
 0xaf9   :  { %v1671_v14 = vsub.f32 1.5, %v1670_v10  ;;  %v1678_v45 = vmul.f32 %v2198_v20, %v1655_v50  ;;  %vm1684_vm12 = vweird.f32 %v2198_v20  ;;  %2010 = vmatmul.msk.f32.gmra.mxu0 %vm47_vm1, %v43_v18  ;;  %v1787_v50 = vld [vmem:[%s3298_s7 + $0x70] sm:$0xff]  ;;  %v1777_v6 = vld [vmem:[%s3298_s7 + $0x20] sm:$0xff] }
 0xafa   :  { %2199 = vrsqrt.f32 %v1656_v11  ;;  %1709 = vrot.lane.b32.xlu1 %v1701_v34, %s2241_s26  ;;  %vm1685_vm14 = vmor %vm1683_vm13, %vm1684_vm12  ;;  %vm1693_vm0 = vweird.f32 %v1656_v11  ;;  %1790 = vmatpush.msra.mxu3 %v1787_v50  ;;  %v1775_v10 = vld [vmem:[%s3298_s7 + $0x10] sm:$0xff]  ;;  %v1773_v34 = vld [vmem:[%s3298_s7] sm:$0xff] }
 0xafb   :  { %v1672_v4 = vmul.f32 %v2196_v24, %v1671_v14  ;;  %v1679_v49 = vmul.f32 %v2198_v20, %v1678_v45 }
 0xafd   :  { %v1680_v26 = vmul.f32 0.5, %v1679_v49  ;;  %v1676_v38 = vsel %vm1675_vm11, %v2196_v24, %v1672_v4  ;;  %v1784_v24 = vld [vmem:[%s3298_s7 + $0x58] sm:$0xff] }
 0xafe   :  { %v1698_v33 = vmul.f32 %v3025_v57, %v1676_v38 }
 0xaff   :  { %v1681_v44 = vsub.f32 1.5, %v1680_v26 }
 0xb00   :  { %v2200_v5 = vpop.eup %2199  ;;  %v1702_v9 = vmul.f32 %v1698_v33, %v1622_v59 }
 0xb01   :  { %v1682_v16 = vmul.f32 %v2198_v20, %v1681_v44  ;;  %v1688_v23 = vmul.f32 %v2200_v5, %v1656_v11  ;;  %vm1694_vm15 = vweird.f32 %v2200_v5  ;;  %2011 = vmatmul.msk.f32.gmra.mxu0 %vm47_vm1, %v44_v62  ;;  %v1774_v11 = vld [vmem:[%s3298_s7 + $0x8] sm:$0xff] }
 0xb02   :  { %1711 = vrot.lane.b32.xlu2 %v1702_v9, %s2241_s26  ;;  %vm1695_vm2 = vmor %vm1693_vm0, %vm1694_vm15 }
 0xb03   :  { %v1689_v58 = vmul.f32 %v2200_v5, %v1688_v23  ;;  %v1686_v28 = vsel %vm1685_vm14, %v2198_v20, %v1682_v16 }
 0xb04   :  { %v1699_v15 = vmul.f32 %v3095_v51, %v1686_v28 }
 0xb05   :  { %v1690_v59 = vmul.f32 0.5, %v1689_v58 }
 0xb06   :  { %v1703_v47 = vmul.f32 %v1699_v15, %v3075_v63  ;;  %v45_v63 = vld [vmem:[%s3293_s2 + $0x30] sm:$0xff] }
 0xb07   :  { %v1691_v48 = vsub.f32 1.5, %v1690_v59 }
 0xb08   :  { %1713 = vrot.lane.b32.xlu0 %v1703_v47, %s2241_s26 }
 0xb09   :  { %v1692_v1 = vmul.f32 %v2200_v5, %v1691_v48  ;;  %2012 = vmatmul.msk.f32.gmra.mxu0 %vm47_vm1, %v45_v63 }
 0xb0b   :  { %v1696_v30 = vsel %vm1695_vm2, %v2200_v5, %v1692_v1 }
 0xb0c   :  { %v1700_v3 = vmul.f32 %v3007_v8, %v1696_v30 }
 0xb0e   :  { %v1704_v43 = vmul.f32 %v1700_v3, %v1624_v25  ;;  %v2268_v25 = vmov 27  }
 0xb10   :  { %1727 = vperm.xlu0 %2134, %v1697_v61   ;;  %1715 = vrot.lane.b32.xlu1 %v1704_v43, %s2241_s26  ;;  %v1776_v61 = vld [vmem:[%s3298_s7 + $0x18] sm:$0xff] }
 0xb11   :  { %2013 = vmatmul.msk.f32.gmra.mxu0 %vm47_vm1, %v46_v19 }
 0xb18   :  { %1732 = vperm.xlu1 %2135, %v1698_v33   ;;  %2137 = vset.pattern.permute.xlu0 %v2267_v39 }
 0xb20   :  { %1737 = vperm.xlu1 %2135, %v1699_v15  }
 0xb28   :  { %2139 = vset.pattern.permute.xlu1 %v2267_v39 }
 0xb5c   :  { %v1712_v17 = vpop.permute.xlu2 %1711 }
 0xb5d   :  { %v1722_v36 = vsub.f32 %v3025_v57, %v1712_v17 }
 0xb6c   :  { %v1710_v55 = vpop.permute.xlu1 %1709 }
 0xb6d   :  { %v1721_v29 = vsub.f32 %v3017_v27, %v1710_v55 }
 0xb6f   :  { %1751 = vperm.xlu2 %2136, %v1721_v29  }
 0xb76   :  { %v3129_v0 = vpop.f32.mrf.mxu0 }
 0xb77   :  { %1756 = vperm.xlu2 %2136, %v1722_v36   ;;  %v300_v14 = vmul.f32 %v3129_v0, %v3129_v0 }
 0xb7a   :  { %v1714_v52 = vpop.permute.xlu0 %1713 }
 0xb7b   :  { %v1723_v2 = vsub.f32 %v3095_v51, %v1714_v52 }
 0xb7d   :  { %1761 = vperm.xlu0 %2137, %v1723_v2  }
 0xb7e   :  { %v3149_v12 = vpop.f32.mrf.mxu0 }
 0xb7f   :  { %2138 = vset.pattern.permute.xlu2 %v2266_v22  ;;  %v1786_v22 = vld [vmem:[%s3298_s7 + $0x68] sm:$0xff]  ;;  %v301_v49 = vmul.f32 %v3149_v12, %v3149_v12 }
 0xb80   :  { %1742 = vperm.xlu2 %2138, %v1700_v3   ;;  %1791 = vmatpush.msra.mxu3 %v1786_v22 }
 0xb82   :  { %v1716_v53 = vpop.permute.xlu1 %1715  ;;  %1792 = vmatpush.msra.mxu3 %v1785_v46  ;;  %v1728_v38 = vpop.permute.xlu0 %1727 }
 0xb83   :  { %v1724_v37 = vsub.f32 %v3007_v8, %v1716_v53  ;;  %v1745_v33 = vmul.f32 %v1728_v38, %v3050_v40 }
 0xb84   :  { %1793 = vmatpush.msra.mxu3 %v1784_v24 }
 0xb85   :  { %1766 = vperm.xlu1 %2139, %v1724_v37  }
 0xb86   :  { %1794 = vmatpush.msra.mxu3 %v1783_v41  ;;  %v3166_v20 = vpop.f32.mrf.mxu0 }
 0xb87   :  { %v302_v26 = vmul.f32 %v3166_v20, %v3166_v20 }
 0xb88   :  { %2140 = vset.pattern.permute.xlu2 %v2268_v25  ;;  %1795 = vmatpush.msra.mxu3 %v1782_v7 }
 0xb89   :  { %1820 = vperm.xlu2 %2140, %v3017_v27  }
 0xb8a   :  { %1796 = vmatpush.msra.mxu3 %v1781_v32  ;;  %v1733_v9 = vpop.permute.xlu1 %1732 }
 0xb8b   :  { %v1746_v18 = vmul.f32 %v1733_v9, %v3055_v35 }
 0xb8c   :  { %1797 = vmatpush.msra.mxu3 %v1780_v56  ;;  %v2269_v56 = vmov 26  }
 0xb8d   :  { %2142 = vset.pattern.permute.xlu1 %v2269_v56  ;;  %2141 = vset.pattern.permute.xlu0 %v2269_v56 }
 0xb8e   :  { %1798 = vmatpush.msra.mxu3 %v1779_v31  ;;  %v3178_v45 = vpop.f32.mrf.mxu0 }
 0xb8f   :  { %v303_v4 = vmul.f32 %v3178_v45, %v3178_v45 }
 0xb90   :  { %1799 = vmatpush.msra.mxu3 %v1778_v54 }
 0xb91   :  { %2143 = vset.pattern.permute.xlu2 %v2269_v56 }
 0xb92   :  { %1800 = vmatpush.msra.mxu3 %v1777_v6  ;;  %v1738_v58 = vpop.permute.xlu1 %1737 }
 0xb93   :  { %v1747_v28 = vmul.f32 %v1738_v58, %v3060_v13 }
 0xb94   :  { %1801 = vmatpush.msra.mxu3 %v1776_v61 }
 0xb96   :  { %1802 = vmatpush.msra.mxu3 %v1775_v10 }
 0xb98   :  { %1803 = vmatpush.msra.mxu3 %v1774_v11 }
 0xb9a   :  { %1804 = vmatpush.msra.mxu3 %v1773_v34 }
 0xba7   :  { %290 = vadd.xlane.f32.xlu0 %v3149_v12 }
 0xbaf   :  { %288 = vadd.xlane.f32.xlu1 %v3129_v0  ;;  %304 = vadd.xlane.f32.xlu0 %v300_v14 }
 0xbb2   :  { %292 = vadd.xlane.f32.xlu2 %v3166_v20 }
 0xbb7   :  { %294 = vadd.xlane.f32.xlu1 %v3178_v45  ;;  %310 = vadd.xlane.f32.xlu0 %v303_v4 }
 0xbba   :  { %306 = vadd.xlane.f32.xlu2 %v301_v49 }
 0xbbf   :  { %308 = vadd.xlane.f32.xlu1 %v302_v26 }
 0xbc9   :  { %v1752_v44 = vpop.permute.xlu2 %1751 }
 0xbca   :  { %v3189_v5 = vadd.f32 %v1752_v44, %v1745_v33 }
 0xbcc   :  { %1805 = vmatmul.f32.vlgmr.msra.gmra.mxu3 %v3189_v5 }
 0xbd1   :  { %v1757_v16 = vpop.permute.xlu2 %1756 }
 0xbd2   :  { %v3193_v23 = vadd.f32 %v1757_v16, %v1746_v18 }
 0xbd4   :  { %1808 = vmatmul.f32.gmra.mxu3 %v3193_v23 }
 0xbda   :  { %v1743_v40 = vpop.permute.xlu2 %1742 }
 0xbdb   :  { %v1748_v47 = vmul.f32 %v1743_v40, %v3065_v60 }
 0xbe3   :  { %v3204_v1 = vpop.permute.xlu2 %1820 }
 0xbef   :  { %v1762_v15 = vpop.permute.xlu0 %1761 }
 0xbf0   :  { %v3197_v59 = vadd.f32 %v1762_v15, %v1747_v28 }
 0xbf2   :  { %1811 = vmatmul.f32.gmra.mxu3 %v3197_v59 }
 0xbf7   :  { %v1767_v62 = vpop.permute.xlu1 %1766 }
 0xbf8   :  { %v3201_v48 = vadd.f32 %v1767_v62, %v1748_v47 }
 0xbfa   :  { %1814 = vmatmul.f32.gmra.mxu3 %v3201_v48 }
 0xc1a   :  { %v291_v35 = vpop.xlane.xlu0 %290 }
 0xc1b   :  { %v3209_v55 = vmul.f32 %v291_v35, %v2429_v42 }
 0xc1d   :  { %v317_v53 = vmul.f32 %v3209_v55, %v3209_v55 }
 0xc22   :  { %v289_v30 = vpop.xlane.xlu1 %288  ;;  %v305_v3 = vpop.xlane.xlu0 %304 }
 0xc23   :  { %v296_v13 = vmul.f32 %v289_v30, %v2429_v42  ;;  %v312_v43 = vmul.f32 %v305_v3, %v2429_v42 }
 0xc25   :  { %v316_v63 = vmul.f32 %v296_v13, %v296_v13  ;;  %v293_v19 = vpop.xlane.xlu2 %292 }
 0xc26   :  { %v3218_v37 = vmul.f32 %v293_v19, %v2429_v42 }
 0xc27   :  { %v320_v39 = vsub.f32 %v312_v43, %v316_v63 }
 0xc28   :  { %v318_v24 = vmul.f32 %v3218_v37, %v3218_v37 }
 0xc29   :  { %v324_v60 = vmax.f32 %v320_v39, 0.0 }
 0xc2a   :  { %v295_v29 = vpop.xlane.xlu1 %294  ;;  %v311_v17 = vpop.xlane.xlu0 %310 }
 0xc2b   :  { %v328_v36 = vadd.f32 1e-05, %v324_v60  ;;  %v3212_v52 = vmul.f32 %v295_v29, %v2429_v42  ;;  %v315_v2 = vmul.f32 %v311_v17, %v2429_v42 }
 0xc2d   :  { %2201 = vrsqrt.f32 %v328_v36  ;;  %v319_v21 = vmul.f32 %v3212_v52, %v3212_v52  ;;  %v307_v50 = vpop.xlane.xlu2 %306  ;;  %vm338_vm1 = vweird.f32 %v328_v36 }
 0xc2e   :  { %v313_v25 = vmul.f32 %v307_v50, %v2429_v42 }
 0xc2f   :  { %v323_v22 = vsub.f32 %v315_v2, %v319_v21 }
 0xc30   :  { %v321_v46 = vsub.f32 %v313_v25, %v317_v53 }
 0xc31   :  { %v327_v41 = vmax.f32 %v323_v22, 0.0 }
 0xc32   :  { %v325_v7 = vmax.f32 %v321_v46, 0.0  ;;  %v309_v32 = vpop.xlane.xlu1 %308 }
 0xc33   :  { %v2202_v31 = vpop.eup %2201  ;;  %v331_v54 = vadd.f32 1e-05, %v327_v41  ;;  %v314_v6 = vmul.f32 %v309_v32, %v2429_v42  ;;  %v2271_v41 = vmov 25  }
 0xc34   :  { %v333_v61 = vmul.f32 %v2202_v31, %v328_v36  ;;  %v329_v10 = vadd.f32 1e-05, %v325_v7  ;;  %vm339_vm3 = vweird.f32 %v2202_v31  ;;  %v1818_v7 = vld [vmem:[%s3299_s5] sm:$0xff] }
 0xc35   :  { %2203 = vrsqrt.f32 %v331_v54  ;;  %v322_v11 = vsub.f32 %v314_v6, %v318_v24  ;;  %vm340_vm4 = vmor %vm338_vm1, %vm339_vm3  ;;  %vm368_vm5 = vweird.f32 %v331_v54 }
 0xc36   :  { %v334_v34 = vmul.f32 %v2202_v31, %v333_v61  ;;  %2205 = vrsqrt.f32 %v329_v10  ;;  %vm348_vm7 = vweird.f32 %v329_v10 }
 0xc37   :  { %v326_v14 = vmax.f32 %v322_v11, 0.0 }
 0xc38   :  { %v335_v4 = vmul.f32 0.5, %v334_v34 }
 0xc39   :  { %v330_v49 = vadd.f32 1e-05, %v326_v14 }
 0xc3a   :  { %v336_v26 = vsub.f32 1.5, %v335_v4 }
 0xc3b   :  { %v2204_v38 = vpop.eup %2203  ;;  %2207 = vrsqrt.f32 %v330_v49  ;;  %vm358_vm12 = vweird.f32 %v330_v49 }
 0xc3c   :  { %v2206_v33 = vpop.eup %2205  ;;  %v337_v44 = vmul.f32 %v2202_v31, %v336_v26  ;;  %v363_v42 = vmul.f32 %v2204_v38, %v331_v54  ;;  %vm369_vm6 = vweird.f32 %v2204_v38 }
 0xc3d   :  { %v343_v9 = vmul.f32 %v2206_v33, %v329_v10  ;;  %vm349_vm8 = vweird.f32 %v2206_v33  ;;  %vm370_vm10 = vmor %vm368_vm5, %vm369_vm6 }
 0xc3e   :  { %v364_v18 = vmul.f32 %v2204_v38, %v363_v42  ;;  %v341_v16 = vsel %vm340_vm4, %v2202_v31, %v337_v44  ;;  %vm350_vm11 = vmor %vm348_vm7, %vm349_vm8 }
 0xc3f   :  { %v344_v58 = vmul.f32 %v2206_v33, %v343_v9  ;;  %v372_v28 = vmul.f32 %v3017_v27, %v341_v16 }
 0xc40   :  { %v365_v15 = vmul.f32 0.5, %v364_v18 }
 0xc41   :  { %v2208_v40 = vpop.eup %2207  ;;  %v345_v47 = vmul.f32 0.5, %v344_v58  ;;  %v376_v62 = vmul.f32 %v372_v28, %v296_v13 }
 0xc42   :  { %v366_v35 = vsub.f32 1.5, %v365_v15  ;;  %v353_v30 = vmul.f32 %v2208_v40, %v330_v49  ;;  %vm359_vm13 = vweird.f32 %v2208_v40 }
 0xc43   :  { %v346_v3 = vsub.f32 1.5, %v345_v47  ;;  %384 = vrot.lane.b32.xlu2 %v376_v62, %s2241_s26  ;;  %vm360_vm14 = vmor %vm358_vm12, %vm359_vm13 }
 0xc44   :  { %v367_v43 = vmul.f32 %v2204_v38, %v366_v35  ;;  %v354_v63 = vmul.f32 %v2208_v40, %v353_v30 }
 0xc45   :  { %v347_v19 = vmul.f32 %v2206_v33, %v346_v3 }
 0xc46   :  { %v355_v39 = vmul.f32 0.5, %v354_v63  ;;  %v371_v60 = vsel %vm370_vm10, %v2204_v38, %v367_v43 }
 0xc47   :  { %v375_v29 = vmul.f32 %v3007_v8, %v371_v60  ;;  %v351_v17 = vsel %vm350_vm11, %v2206_v33, %v347_v19 }
 0xc48   :  { %v356_v36 = vsub.f32 1.5, %v355_v39  ;;  %v373_v13 = vmul.f32 %v3025_v57, %v351_v17 }
 0xc49   :  { %v379_v2 = vmul.f32 %v375_v29, %v3212_v52  ;;  %v2270_v52 = vmov 24  }
 0xc4a   :  { %v357_v53 = vmul.f32 %v2208_v40, %v356_v36  ;;  %v377_v21 = vmul.f32 %v373_v13, %v3209_v55 }
 0xc4b   :  { %390 = vrot.lane.b32.xlu2 %v379_v2, %s2241_s26 }
 0xc4c   :  { %386 = vrot.lane.b32.xlu1 %v377_v21, %s2241_s26  ;;  %v361_v50 = vsel %vm360_vm14, %v2208_v40, %v357_v53 }
 0xc4d   :  { %v374_v25 = vmul.f32 %v3095_v51, %v361_v50 }
 0xc4f   :  { %v378_v22 = vmul.f32 %v374_v25, %v3218_v37  ;;  %v1806_v55 = vpop.f32.mrf.mxu3 }
 0xc51   :  { %388 = vrot.lane.b32.xlu0 %v378_v22, %s2241_s26 }
 0xc53   :  { %1860 = vperm.xlu2 %2143, %v3095_v51  }
 0xc54   :  { %1856 = vperm.xlu1 %2142, %v3025_v57  }
 0xc57   :  { %v1809_v37 = vpop.f32.mrf.mxu3 }
 0xc59   :  { %1852 = vperm.xlu0 %2141, %v3017_v27  }
 0xc5b   :  { %2144 = vset.pattern.permute.xlu2 %v2270_v52 }
 0xc5c   :  { %1864 = vperm.xlu1 %2142, %v3007_v8   ;;  %402 = vperm.xlu2 %2144, %v372_v28  }
 0xc61   :  { %2145 = vset.pattern.permute.xlu0 %v2270_v52 }
 0xc62   :  { %407 = vperm.xlu0 %2145, %v373_v13  }
 0xc64   :  { %2146 = vset.pattern.permute.xlu1 %v2270_v52  ;;  %417 = vperm.xlu2 %2144, %v375_v29  }
 0xc65   :  { %412 = vperm.xlu1 %2146, %v374_v25  }
 0xc6a   :  { %2149 = vset.pattern.permute.xlu0 %v2271_v41 }
 0xc6c   :  { %2148 = vset.pattern.permute.xlu2 %v2271_v41 }
 0xc6d   :  { %2147 = vset.pattern.permute.xlu1 %v2271_v41 }
 0xc75   :  { %v1812_v46 = vpop.f32.mrf.mxu3 }
 0xc7d   :  { %v1815_v24 = vpop.f32.mrf.mxu3 }
 0xc7e   :  { %1838 = vmatpush.msra.mxu1 %v1815_v24 }
 0xc80   :  { %1839 = vmatpush.msra.mxu1 %v1812_v46 }
 0xc82   :  { %1840 = vmatpush.msra.mxu1 %v1809_v37 }
 0xc84   :  { %1841 = vmatpush.msra.mxu1 %v1806_v55 }
 0xc85   :  { %2022 = vmatmul.msk.f32.vlgmr.msra.gmra.mxu1 %vm1194_vm9, %v1818_v7  ;;  %vm1867_vm9 = vcmask 64512  }
 0xc9d   :  { %v385_v32 = vpop.permute.xlu2 %384 }
 0xc9e   :  { %v396_v31 = vsub.f32 %v3017_v27, %v385_v32  ;;  %v1847_v27 = vld [vmem:[%s3300_s6] sm:$0xff] }
 0xca0   :  { %426 = vperm.xlu1 %2147, %v396_v31  }
 0xca5   :  { %v391_v54 = vpop.permute.xlu2 %390 }
 0xca6   :  { %v399_v6 = vsub.f32 %v3007_v8, %v391_v54  ;;  %v1848_v8 = vld [vmem:[%s3300_s6 + $0x8] sm:$0xff] }
 0xca8   :  { %441 = vperm.xlu1 %2147, %v399_v6  }
 0xcad   :  { %v1861_v44 = vpop.permute.xlu2 %1860 }
 0xcb6   :  { %v403_v47 = vpop.permute.xlu2 %402 }
 0xcb7   :  { %v420_v50 = vmul.f32 %v403_v47, %v3129_v0 }
 0xcbe   :  { %v387_v61 = vpop.permute.xlu1 %386  ;;  %v3269_v25 = vpop.permute.xlu2 %417 }
 0xcbf   :  { %v397_v10 = vsub.f32 %v3025_v57, %v387_v61  ;;  %v1849_v57 = vld [vmem:[%s3300_s6 + $0x10] sm:$0xff] }
 0xcc1   :  { %431 = vperm.xlu2 %2148, %v397_v10  }
 0xcc3   :  { %v389_v11 = vpop.permute.xlu0 %388 }
 0xcc4   :  { %v398_v34 = vsub.f32 %v3095_v51, %v389_v11  ;;  %v1850_v51 = vld [vmem:[%s3300_s6 + $0x18] sm:$0xff] }
 0xcc6   :  { %436 = vperm.xlu0 %2149, %v398_v34  }
 0xcce   :  { %2150 = vset.pattern.permute.xlu0 %v2269_v56  ;;  %v1853_v56 = vpop.permute.xlu0 %1852 }
 0xcd6   :  { %v408_v61 = vpop.permute.xlu0 %407 }
 0xd02   :  { %v1843_v14 = vpop.f32.mrf.mxu1 }
 0xd03   :  { %v1844_v4 = vadd.f32 %v1843_v14, %v3204_v1  ;;  %v1857_v1 = vpop.permute.xlu1 %1856 }
 0xd05   :  { %v1846_v49 = vmax.f32 %v1844_v4, 0.0 }
 0xd07   :  { %1895 = vmatpush.msrb.mxu2 %v1846_v49 }
 0xd08   :  { %2023 = vmatmul.msk.f32.vlgmr.msrb.gmra.mxu2 %vm1867_vm9, %v1847_v27 }
 0xd0b   :  { %v1865_v18 = vpop.permute.xlu1 %1864 }
 0xd10   :  { %2024 = vmatmul.msk.f32.gmra.mxu2 %vm1867_vm9, %v1848_v8  ;;  %v421_v8 = vmul.f32 %v408_v61, %v3149_v12 }
 0xd13   :  { %v3266_v3 = vpop.permute.xlu1 %412 }
 0xd18   :  { %2025 = vmatmul.msk.f32.gmra.mxu2 %vm1867_vm9, %v1849_v57 }
 0xd1b   :  { %v427_v22 = vpop.permute.xlu1 %426  ;;  %v432_v4 = vpop.permute.xlu2 %431 }
 0xd1c   :  { %v444_v41 = vadd.f32 %v427_v22, %v420_v50 }
 0xd20   :  { %2026 = vmatmul.msk.f32.gmra.mxu2 %vm1867_vm9, %v1850_v51 }
 0xd8b   :  { %v1897_v26 = vpop.f32.mrf.mxu2 }
 0xd8c   :  { %v1898_v38 = vadd.f32 %v1897_v26, %v1853_v56 }
 0xd8e   :  { %v2027_v33 = vmul.f32 -1.442695, %v1898_v38 }
 0xd90   :  { %2209 = vpow2.f32 %v2027_v33 }
 0xd93   :  { %v1900_v42 = vpop.f32.mrf.mxu2 }
 0xd94   :  { %v1901_v9 = vadd.f32 %v1900_v42, %v1857_v1  ;;  %v445_v1 = vadd.f32 %v432_v4, %v421_v8 }
 0xd96   :  { %v2210_v16 = vpop.eup %2209  ;;  %v2028_v58 = vmul.f32 -1.442695, %v1901_v9 }
 0xd97   :  { %v1921_v28 = vadd.f32 1.0, %v2210_v16  ;;  %v437_v16 = vpop.permute.xlu0 %436 }
 0xd98   :  { %2211 = vpow2.f32 %v2028_v58 }
 0xd99   :  { %2213 = vrcp.f32 %v1921_v28  ;;  %v1936_v39 = vand.u32 2147483648, %v1921_v28  ;;  %v1934_v17 = vand.u32 2147483647, %v1921_v28  ;;  %vm1930_vm0 = vweird.f32 %v1921_v28 }
 0xd9b   :  { %v1903_v15 = vpop.f32.mrf.mxu2  ;;  %v1937_v52 = vor.u32 1.1754944e-38, %v1936_v39  ;;  %vm1935_vm1 = vcmp.eq.f32.partialorder %v1934_v17, 8.507059e+37 }
 0xd9c   :  { %v1904_v40 = vadd.f32 %v1903_v15, %v1861_v44 }
 0xd9e   :  { %v2212_v62 = vpop.eup %2211  ;;  %v2029_v35 = vmul.f32 -1.442695, %v1904_v40 }
 0xd9f   :  { %v2214_v30 = vpop.eup %2213  ;;  %v1922_v43 = vadd.f32 1.0, %v2212_v62 }
 0xda0   :  { %v1926_v63 = vmul.f32 %v2214_v30, %v1921_v28  ;;  %2215 = vpow2.f32 %v2029_v35  ;;  %vm1931_vm15 = vweird.f32 %v2214_v30  ;;  %v422_v28 = vmul.f32 %v3266_v3, %v3166_v20  ;;  %v442_v20 = vpop.permute.xlu1 %441 }
 0xda1   :  { %2217 = vrcp.f32 %v1922_v43  ;;  %vm1932_vm2 = vmor %vm1930_vm0, %vm1931_vm15  ;;  %v1951_v31 = vand.u32 2147483648, %v1922_v43  ;;  %v1949_v0 = vand.u32 2147483647, %v1922_v43  ;;  %vm1945_vm4 = vweird.f32 %v1922_v43 }
 0xda2   :  { %v1927_v19 = vsub.f32 1.0, %v1926_v63  ;;  %v446_v47 = vadd.f32 %v437_v16, %v422_v28 }
 0xda3   :  { %v1906_v60 = vpop.f32.mrf.mxu2  ;;  %v1952_v49 = vor.u32 1.1754944e-38, %v1951_v31  ;;  %vm1950_vm6 = vcmp.eq.f32.partialorder %v1949_v0, 8.507059e+37 }
 0xda4   :  { %v1928_v29 = vmul.f32 %v2214_v30, %v1927_v19  ;;  %v1907_v36 = vadd.f32 %v1906_v60, %v1865_v18 }
 0xda6   :  { %v2216_v13 = vpop.eup %2215  ;;  %v1929_v2 = vadd.f32 %v2214_v30, %v1928_v29  ;;  %v2030_v53 = vmul.f32 -1.442695, %v1907_v36  ;;  %v423_v29 = vmul.f32 %v3269_v25, %v3178_v45 }
 0xda7   :  { %v2218_v21 = vpop.eup %2217  ;;  %v1923_v55 = vadd.f32 1.0, %v2216_v13 }
 0xda8   :  { %v1933_v37 = vsel %vm1932_vm2, %v2214_v30, %v1929_v2  ;;  %v1941_v46 = vmul.f32 %v2218_v21, %v1922_v43  ;;  %2219 = vpow2.f32 %v2030_v53  ;;  %vm1946_vm3 = vweird.f32 %v2218_v21 }
 0xda9   :  { %v1938_v24 = vsel %vm1935_vm1, %v1937_v52, %v1933_v37  ;;  %2221 = vrcp.f32 %v1923_v55  ;;  %vm1947_vm5 = vmor %vm1945_vm4, %vm1946_vm3  ;;  %v1966_v38 = vand.u32 2147483648, %v1923_v55  ;;  %v1964_v42 = vand.u32 2147483647, %v1923_v55 }
 0xdaa   :  { %v1985_v7 = vmul.f32 %v1938_v24, %v3189_v5  ;;  %v1942_v32 = vsub.f32 1.0, %v1941_v46  ;;  %vm1960_vm8 = vweird.f32 %v1923_v55  ;;  %v447_v36 = vadd.f32 %v442_v20, %v423_v29 }
 0xdab   :  { %v1967_v58 = vor.u32 1.1754944e-38, %v1966_v38  ;;  %vm1965_vm11 = vcmp.eq.f32.partialorder %v1964_v42, 8.507059e+37 }
 0xdac   :  { %v1989_v54 = vadd.f32 %v1985_v7, %v444_v41  ;;  %v1943_v6 = vmul.f32 %v2218_v21, %v1942_v32 }
 0xdae   :  { %v2220_v10 = vpop.eup %2219  ;;  %v1993_v11 = vmax.f32 %v1989_v54, 0.0  ;;  %v1944_v34 = vadd.f32 %v2218_v21, %v1943_v6 }
 0xdaf   :  { %v2222_v14 = vpop.eup %2221  ;;  %v1924_v27 = vadd.f32 1.0, %v2220_v10 }
 0xdb0   :  { %1997 = vst [vmem:[%s3301_s9] sm:$0xff] %v1993_v11  ;;  %v1948_v5 = vsel %vm1947_vm5, %v2218_v21, %v1944_v34  ;;  %v1956_v57 = vmul.f32 %v2222_v14, %v1923_v55  ;;  %vm1961_vm7 = vweird.f32 %v2222_v14 }
 0xdb1   :  { %v1953_v51 = vsel %vm1950_vm6, %v1952_v49, %v1948_v5  ;;  %2223 = vrcp.f32 %v1924_v27  ;;  %vm1962_vm10 = vmor %vm1960_vm8, %vm1961_vm7  ;;  %v1981_v30 = vand.u32 2147483648, %v1924_v27  ;;  %v1979_v19 = vand.u32 2147483647, %v1924_v27 }
 0xdb2   :  { %v1986_v56 = vmul.f32 %v1953_v51, %v3193_v23  ;;  %v1957_v26 = vsub.f32 1.0, %v1956_v57  ;;  %vm1975_vm13 = vweird.f32 %v1924_v27 }
 0xdb3   :  { %v1982_v3 = vor.u32 1.1754944e-38, %v1981_v30  ;;  %vm1980_vm9 = vcmp.eq.f32.partialorder %v1979_v19, 8.507059e+37 }
 0xdb4   :  { %v1990_v33 = vadd.f32 %v1986_v56, %v445_v1  ;;  %v1958_v44 = vmul.f32 %v2222_v14, %v1957_v26 }
 0xdb6   :  { %v1994_v9 = vmax.f32 %v1990_v33, 0.0  ;;  %v1959_v12 = vadd.f32 %v2222_v14, %v1958_v44 }
 0xdb7   :  { %v2224_v18 = vpop.eup %2223 }
 0xdb8   :  { %1998 = vst [vmem:[%s3301_s9 + $0x8] sm:$0xff] %v1994_v9  ;;  %v1963_v23 = vsel %vm1962_vm10, %v2222_v14, %v1959_v12  ;;  %v1971_v15 = vmul.f32 %v2224_v18, %v1924_v27  ;;  %vm1976_vm12 = vweird.f32 %v2224_v18 }
 0xdb9   :  { %v1968_v40 = vsel %vm1965_vm11, %v1967_v58, %v1963_v23  ;;  %vm1977_vm14 = vmor %vm1975_vm13, %vm1976_vm12 }
 0xdba   :  { %v1987_v62 = vmul.f32 %v1968_v40, %v3197_v59  ;;  %v1972_v35 = vsub.f32 1.0, %v1971_v15 }
 0xdbc   :  { %v1991_v43 = vadd.f32 %v1987_v62, %v446_v47  ;;  %v1973_v63 = vmul.f32 %v2224_v18, %v1972_v35 }
 0xdbe   :  { %v1995_v39 = vmax.f32 %v1991_v43, 0.0  ;;  %v1974_v60 = vadd.f32 %v2224_v18, %v1973_v63 }
 0xdc0   :  { %1999 = vst [vmem:[%s3301_s9 + $0x10] sm:$0xff] %v1995_v39  ;;  %v1978_v59 = vsel %vm1977_vm14, %v2224_v18, %v1974_v60 }
 0xdc1   :  { %v1983_v17 = vsel %vm1980_vm9, %v1982_v3, %v1978_v59 }
 0xdc2   :  { %v1988_v13 = vmul.f32 %v1983_v17, %v3201_v48 }
 0xdc4   :  { %v1992_v2 = vadd.f32 %v1988_v13, %v447_v36 }
 0xdc6   :  { %v1996_v53 = vmax.f32 %v1992_v2, 0.0 }
 0xdc8   :  { %2000 = vst [vmem:[%s3301_s9 + $0x18] sm:$0xff] %v1996_v53 }

</bundles_post_ra>
